<compile_context>
chip_gen: v7x
topology: tpu7x:2x2x1
jax: 0.10.0
libtpu: 0.0.40
codegen_flags: <defaults>
</compile_context>

<pallas_src>
import jax
import jax.numpy as jnp
import numpy as np
from jax import lax
from jax.experimental import pallas as pl
from jax.experimental.pallas import tpu as pltpu


def _fused_local_features_kernel(x_ref, w1_ref, w2_ref, p_ref, o_ref, xp_ref):
    """Fused ConvBlock x2 for a tile of B images.

    x_ref  : (B, H, W, C)        unpadded input tile
    w*_ref : (3*C, 3*C)  bf16    packed conv weights: rows = (dw-major, Cin-minor),
                                 cols = (dh-major, Cout-minor)  (3 dh taps on N)
    p_ref  : (6, C)      f32     rows = [b1, s1, t1, b2, s2, t2]
                                 (bias, folded BN scale, folded BN shift)
    o_ref  : (B, H, W*C)         lane-dense output slab
    xp_ref : (B, H+2, W+2, C) f32  zero-halo padded scratch (reused by both blocks)
    """
    B, H, W, C = x_ref.shape
    Hp, Wp = H + 2, W + 2

    # Zero ONLY the 4 halo strips (not the whole scratch): the interior is fully
    # overwritten before each conv, and this stays correct even when the grid is
    # sharded across TensorCores (each core's scratch gets its halo zeroed).
    zrow = jnp.zeros((B, 1, Wp, C), jnp.float32)
    zcol = jnp.zeros((B, Hp, 1, C), jnp.float32)
    xp_ref[:, 0:1, :, :] = zrow
    xp_ref[:, Hp - 1:Hp, :, :] = zrow
    xp_ref[:, :, 0:1, :] = zcol
    xp_ref[:, :, Wp - 1:Wp, :] = zcol

    # Stage the input into the padded-scratch interior.
    xp_ref[:, 1:H + 1, 1:W + 1, :] = x_ref[...].astype(xp_ref.dtype)

    def conv3x3_relu_bn(w_ref, prow):
        # im2col over the THREE dw taps only (lane axis: dw-major, Cin-minor),
        # built ONCE per conv over all padded-H rows; the 3 dh taps are packed
        # along the matmul N dimension instead of being separate matmuls.
        P = jnp.concatenate(
            [xp_ref[:, :, dw:dw + W, :].astype(jnp.bfloat16) for dw in range(3)],
            axis=-1)                                               # (B, Hp, W, 3C) bf16
        Z = jnp.dot(P.reshape(B * Hp * W, 3 * C), w_ref[...],
                    preferred_element_type=jnp.float32)            # (B*Hp*W, 3C) f32
        Z = Z.reshape(B, Hp, W, 3 * C)
        # Combine the three dh partials: row offsets 0/1/2 on the padded-H axis
        # (cheap vreg-group selection) + 64-lane column slices.
        acc = (Z[:, 0:H, :, 0:C]
               + Z[:, 1:H + 1, :, C:2 * C]
               + Z[:, 2:H + 2, :, 2 * C:3 * C])                    # (B, H, W, C) f32
        bias = p_ref[prow + 0:prow + 1, :].reshape(1, 1, 1, C)
        scale = p_ref[prow + 1:prow + 2, :].reshape(1, 1, 1, C)
        shift = p_ref[prow + 2:prow + 3, :].reshape(1, 1, 1, C)
        y = jnp.maximum(acc + bias, 0.0)            # conv bias fused into the ReLU
        return y * scale + shift                    # eval-mode BatchNorm (folded)

    # Block 1 -> re-pad intermediate in VMEM -> Block 2 (no HBM round trip).
    y1 = conv3x3_relu_bn(w1_ref, 0)
    xp_ref[:, 1:H + 1, 1:W + 1, :] = y1.astype(xp_ref.dtype)
    y2 = conv3x3_relu_bn(w2_ref, 3)

    # Lane-dense store: last dim = W*C (multiple of 128) -> unmasked full vst.
    o_ref[...] = y2.reshape(B, H, W * C).astype(o_ref.dtype)


def _batch_tile(n, hw, m_cap=8192, min_steps=2):
    """Largest divisor of n whose folded M = d*hw stays under m_cap.

    Prefers a grid of at least `min_steps` steps so that on v7x (2 TensorCores
    per chip, dimension_semantics=('parallel',)) both cores get work.
    If hw alone exceeds m_cap, falls back to 1 image per step (correct, just
    uses more VMEM per step than the cap intended).
    """
    divs = [d for d in range(1, n + 1) if n % d == 0]
    fits = [d for d in divs if d * hw <= m_cap]
    if not fits:
        return 1
    multi = [d for d in fits if n // d >= min_steps]
    return max(multi) if multi else max(fits)


def _pack_weight(w):
    """HWIO (3,3,Cin,Cout) -> bf16 (3*Cin, 3*Cout).

    Rows ordered (dw-major, Cin-minor) to match the in-kernel patch lanes;
    columns ordered (dh-major, Cout-minor): the three kernel-row taps are
    packed along the MXU N dimension."""
    kh, kw, ci, co = w.shape
    return jnp.transpose(w, (1, 2, 0, 3)).reshape(kw * ci, kh * co).astype(jnp.bfloat16)


def local_features_nhwc(x, params1, params2):
    """Fused LocalFeatures forward on an NHWC tensor."""
    N, H, W, C = x.shape
    w1, b1, s1, t1 = params1
    w2, b2, s2, t2 = params2
    Cout = w1.shape[-1]
    assert C == 64 and Cout == 64, "LocalFeatures is fixed at 64 -> 64 channels"

    bt = _batch_tile(N, H * W)
    grid = (N // bt,)

    w1p = _pack_weight(w1)
    w2p = _pack_weight(w2)
    # One (6, C) per-channel table: [b1, s1, t1, b2, s2, t2] -> a single tiny DMA.
    ptab = jnp.stack([b1, s1, t1, b2, s2, t2], axis=0).astype(jnp.float32)

    out = pl.pallas_call(
        _fused_local_features_kernel,
        out_shape=jax.ShapeDtypeStruct((N, H, W * Cout), x.dtype),
        grid_spec=pltpu.PrefetchScalarGridSpec(
            num_scalar_prefetch=0,
            grid=grid,
            in_specs=[
                pl.BlockSpec((bt, H, W, C), lambda n: (n, 0, 0, 0)),
                pl.BlockSpec((3 * C, 3 * Cout), lambda n: (0, 0)),
                pl.BlockSpec((3 * Cout, 3 * Cout), lambda n: (0, 0)),
                pl.BlockSpec((6, Cout), lambda n: (0, 0)),
            ],
            out_specs=pl.BlockSpec((bt, H, W * Cout), lambda n: (n, 0, 0)),
            scratch_shapes=[pltpu.VMEM((bt, H + 2, W + 2, Cout), jnp.float32)],
        ),
        compiler_params=pltpu.CompilerParams(
            dimension_semantics=("parallel",),
            vmem_limit_bytes=32 * 1024 * 1024,   # explicit (v5e default is 16 MiB)
        ),
    )(x, w1p, w2p, ptab)

    return out.reshape(N, H, W, Cout)


def local_features(x_nchw, params1, params2):
    """Forward pass of LocalFeatures. Accepts NCHW (PyTorch), returns NCHW."""
    x = jnp.transpose(x_nchw, (0, 2, 3, 1))          # NCHW -> NHWC
    y = local_features_nhwc(x, params1, params2)
    return jnp.transpose(y, (0, 3, 1, 2))            # NHWC -> NCHW


def init_convblock_params(key, cin, cout, k=3, eps=1e-5):
    """Deterministic parameter init mirroring the PyTorch module's shapes."""
    kw, kb = jax.random.split(key)
    fan_in = cin * k * k
    bound = 1.0 / np.sqrt(fan_in)
    # Conv2d weight stored directly as HWIO.
    w = jax.random.uniform(kw, (k, k, cin, cout), jnp.float32, -bound, bound)
    b = jax.random.uniform(kb, (cout,), jnp.float32, -bound, bound)
    # BatchNorm2d defaults: weight=1, bias=0, running_mean=0, running_var=1.
    gamma = jnp.ones((cout,), jnp.float32)
    beta = jnp.zeros((cout,), jnp.float32)
    running_mean = jnp.zeros((cout,), jnp.float32)
    running_var = jnp.ones((cout,), jnp.float32)
    scale = gamma / jnp.sqrt(running_var + eps)
    shift = beta - running_mean * scale
    return w, b, scale, shift


def _reference(x_nchw, params1, params2):
    """Pure-JAX f32 reference (ground-truth module semantics)."""
    def block(x_nhwc, w, b, scale, shift):
        y = lax.conv_general_dilated(
            x_nhwc, w, window_strides=(1, 1), padding=((1, 1), (1, 1)),
            dimension_numbers=("NHWC", "HWIO", "NHWC"))
        y = y + b[None, None, None, :]
        y = jnp.maximum(y, 0.0)
        return y * scale[None, None, None, :] + shift[None, None, None, :]

    x = jnp.transpose(x_nchw, (0, 2, 3, 1))
    x = block(x, *params1)
    x = block(x, *params2)
    return jnp.transpose(x, (0, 3, 1, 2))


if __name__ == "__main__":
    key = jax.random.PRNGKey(0)
    kx, k1, k2 = jax.random.split(key, 3)

    N, C, H, W = 2, 64, 16, 16          # LocalFeatures requires 64 input channels
    x = jax.random.normal(kx, (N, C, H, W), jnp.float32)

    params1 = init_convblock_params(k1, 64, 64)
    params2 = init_convblock_params(k2, 64, 64)

    out = jax.jit(local_features)(x, params1, params2)
    out = jax.block_until_ready(out)

    ref = jax.block_until_ready(_reference(x, params1, params2))
    assert out.shape == (N, 64, H, W)
    # Tolerance loosened vs the pure-f32 version: the MXU matmuls now run on
    # bf16 operands (f32 accumulation), per the performance review.
    np.testing.assert_allclose(np.asarray(out), np.asarray(ref),
                               rtol=5e-2, atol=5e-2)

    print("KERNEL_OK")
</pallas_src>

<mosaic_0001>
module attributes {stable_mosaic.version = 11 : i64} {
  func.func @_fused_local_features_kernel(%arg0: i32, %arg1: memref<1x16x16x64xf32, #tpu.memory_space<vmem>>, %arg2: memref<192x192xbf16, #tpu.memory_space<vmem>>, %arg3: memref<192x192xbf16, #tpu.memory_space<vmem>>, %arg4: memref<6x64xf32, #tpu.memory_space<vmem>>, %arg5: memref<1x16x1024xf32, #tpu.memory_space<vmem>>, %arg6: memref<1x18x18x64xf32, #tpu.memory_space<vmem>>) attributes {dimension_semantics = [#tpu.dimension_semantics<parallel>], iteration_bounds = array<i64: 2>, scalar_prefetch = 0 : i64, scratch_operands = 1 : i64, tpu.core_type = #tpu.core_type<tc>, window_params = [{transform_indices = @transform_0, window_bounds = array<i64: 1, 16, 16, 64>}, {pipeline_mode = #tpu.pipeline_mode<synchronous>, transform_indices = @transform_1, window_bounds = array<i64: 192, 192>}, {pipeline_mode = #tpu.pipeline_mode<synchronous>, transform_indices = @transform_2, window_bounds = array<i64: 192, 192>}, {pipeline_mode = #tpu.pipeline_mode<synchronous>, transform_indices = @transform_3, window_bounds = array<i64: 6, 64>}, {transform_indices = @transform_4, window_bounds = array<i64: 1, 16, 1024>}]} {
    %cst = arith.constant 0.000000e+00 : f32
    %0 = vector.broadcast %cst : f32 to vector<1x1x18x64xf32>
    %cst_0 = arith.constant 0.000000e+00 : f32
    %1 = vector.broadcast %cst_0 : f32 to vector<1x18x1x64xf32>
    %c0 = arith.constant 0 : index
    %c0_1 = arith.constant 0 : index
    %c0_2 = arith.constant 0 : index
    %c0_3 = arith.constant 0 : index
    %2 = vector.load %arg6[%c0, %c0_1, %c0_2, %c0_3] : memref<1x18x18x64xf32, #tpu.memory_space<vmem>>, vector<1x1x18x64xf32>
    tpu.vector_store %arg6[%c0, %c0_1, %c0_2, %c0_3], %0 {strides = array<i32>} : memref<1x18x18x64xf32, #tpu.memory_space<vmem>>, vector<1x1x18x64xf32>,
    %c0_4 = arith.constant 0 : index
    %c17 = arith.constant 17 : index
    %c0_5 = arith.constant 0 : index
    %c0_6 = arith.constant 0 : index
    %3 = vector.load %arg6[%c0_4, %c17, %c0_5, %c0_6] : memref<1x18x18x64xf32, #tpu.memory_space<vmem>>, vector<1x1x18x64xf32>
    tpu.vector_store %arg6[%c0_4, %c17, %c0_5, %c0_6], %0 {strides = array<i32>} : memref<1x18x18x64xf32, #tpu.memory_space<vmem>>, vector<1x1x18x64xf32>,
    %c0_7 = arith.constant 0 : index
    %c0_8 = arith.constant 0 : index
    %c0_9 = arith.constant 0 : index
    %c0_10 = arith.constant 0 : index
    %4 = vector.load %arg6[%c0_7, %c0_8, %c0_9, %c0_10] : memref<1x18x18x64xf32, #tpu.memory_space<vmem>>, vector<1x18x1x64xf32>
    tpu.vector_store %arg6[%c0_7, %c0_8, %c0_9, %c0_10], %1 {strides = array<i32>} : memref<1x18x18x64xf32, #tpu.memory_space<vmem>>, vector<1x18x1x64xf32>,
    %c0_11 = arith.constant 0 : index
    %c0_12 = arith.constant 0 : index
    %c17_13 = arith.constant 17 : index
    %c0_14 = arith.constant 0 : index
    %5 = vector.load %arg6[%c0_11, %c0_12, %c17_13, %c0_14] : memref<1x18x18x64xf32, #tpu.memory_space<vmem>>, vector<1x18x1x64xf32>
    tpu.vector_store %arg6[%c0_11, %c0_12, %c17_13, %c0_14], %1 {strides = array<i32>} : memref<1x18x18x64xf32, #tpu.memory_space<vmem>>, vector<1x18x1x64xf32>,
    %c0_15 = arith.constant 0 : index
    %c0_16 = arith.constant 0 : index
    %c0_17 = arith.constant 0 : index
    %c0_18 = arith.constant 0 : index
    %6 = vector.load %arg1[%c0_15, %c0_16, %c0_17, %c0_18] : memref<1x16x16x64xf32, #tpu.memory_space<vmem>>, vector<1x16x16x64xf32>
    %c0_19 = arith.constant 0 : index
    %c1 = arith.constant 1 : index
    %c1_20 = arith.constant 1 : index
    %c0_21 = arith.constant 0 : index
    %7 = vector.load %arg6[%c0_19, %c1, %c1_20, %c0_21] : memref<1x18x18x64xf32, #tpu.memory_space<vmem>>, vector<1x16x16x64xf32>
    tpu.vector_store %arg6[%c0_19, %c1, %c1_20, %c0_21], %6 {strides = array<i32>} : memref<1x18x18x64xf32, #tpu.memory_space<vmem>>, vector<1x16x16x64xf32>,
    %c0_22 = arith.constant 0 : index
    %c0_23 = arith.constant 0 : index
    %c0_24 = arith.constant 0 : index
    %c0_25 = arith.constant 0 : index
    %8 = vector.load %arg6[%c0_22, %c0_23, %c0_24, %c0_25] : memref<1x18x18x64xf32, #tpu.memory_space<vmem>>, vector<1x18x16x64xf32>
    %9 = arith.truncf %8 : vector<1x18x16x64xf32> to vector<1x18x16x64xbf16>
    %c0_26 = arith.constant 0 : index
    %c0_27 = arith.constant 0 : index
    %c1_28 = arith.constant 1 : index
    %c0_29 = arith.constant 0 : index
    %10 = vector.load %arg6[%c0_26, %c0_27, %c1_28, %c0_29] : memref<1x18x18x64xf32, #tpu.memory_space<vmem>>, vector<1x18x16x64xf32>
    %11 = arith.truncf %10 : vector<1x18x16x64xf32> to vector<1x18x16x64xbf16>
    %c0_30 = arith.constant 0 : index
    %c0_31 = arith.constant 0 : index
    %c2 = arith.constant 2 : index
    %c0_32 = arith.constant 0 : index
    %12 = vector.load %arg6[%c0_30, %c0_31, %c2, %c0_32] : memref<1x18x18x64xf32, #tpu.memory_space<vmem>>, vector<1x18x16x64xf32>
    %13 = arith.truncf %12 : vector<1x18x16x64xf32> to vector<1x18x16x64xbf16>
    %14 = tpu.concatenate %9, %11, %13 in 3 : vector<1x18x16x64xbf16>, vector<1x18x16x64xbf16>, vector<1x18x16x64xbf16> -> vector<1x18x16x192xbf16>
    %15 = vector.shape_cast %14 : vector<1x18x16x192xbf16> to vector<288x192xbf16>
    %c0_33 = arith.constant 0 : index
    %c0_34 = arith.constant 0 : index
    %16 = vector.load %arg2[%c0_33, %c0_34] : memref<192x192xbf16, #tpu.memory_space<vmem>>, vector<192x192xbf16>
    %cst_35 = arith.constant dense<0.000000e+00> : vector<288x192xf32>
    %17 = tpu.matmul %15, %16, %cst_35 {dimension_numbers = #tpu.dot_dimension_numbers<[1], [0], [0], [1], [0, 0, 1, 1], [], []>} : vector<288x192xbf16>, vector<192x192xbf16>, vector<288x192xf32> -> vector<288x192xf32>
    %18 = vector.shape_cast %17 : vector<288x192xf32> to vector<1x18x16x192xf32>
    %19 = vector.extract_strided_slice %18 {offsets = [0, 0, 0, 0], sizes = [1, 16, 16, 64], strides = [1, 1, 1, 1]} : vector<1x18x16x192xf32> to vector<1x16x16x64xf32>
    %20 = vector.extract_strided_slice %18 {offsets = [0, 1, 0, 64], sizes = [1, 16, 16, 64], strides = [1, 1, 1, 1]} : vector<1x18x16x192xf32> to vector<1x16x16x64xf32>
    %21 = arith.addf %19, %20 : vector<1x16x16x64xf32>
    %22 = vector.extract_strided_slice %18 {offsets = [0, 2, 0, 128], sizes = [1, 16, 16, 64], strides = [1, 1, 1, 1]} : vector<1x18x16x192xf32> to vector<1x16x16x64xf32>
    %23 = arith.addf %21, %22 : vector<1x16x16x64xf32>
    %c0_36 = arith.constant 0 : index
    %c0_37 = arith.constant 0 : index
    %24 = vector.load %arg4[%c0_36, %c0_37] : memref<6x64xf32, #tpu.memory_space<vmem>>, vector<1x64xf32>
    %25 = vector.shape_cast %24 : vector<1x64xf32> to vector<1x1x1x64xf32>
    %c1_38 = arith.constant 1 : index
    %c0_39 = arith.constant 0 : index
    %26 = vector.load %arg4[%c1_38, %c0_39] : memref<6x64xf32, #tpu.memory_space<vmem>>, vector<1x64xf32>
    %27 = vector.shape_cast %26 : vector<1x64xf32> to vector<1x1x1x64xf32>
    %c2_40 = arith.constant 2 : index
    %c0_41 = arith.constant 0 : index
    %28 = vector.load %arg4[%c2_40, %c0_41] : memref<6x64xf32, #tpu.memory_space<vmem>>, vector<1x64xf32>
    %29 = vector.shape_cast %28 : vector<1x64xf32> to vector<1x1x1x64xf32>
    %30 = vector.broadcast %25 : vector<1x1x1x64xf32> to vector<1x16x16x64xf32>
    %31 = arith.addf %23, %30 : vector<1x16x16x64xf32>
    %cst_42 = arith.constant 0.000000e+00 : f32
    %32 = vector.broadcast %cst_42 : f32 to vector<1x16x16x64xf32>
    %33 = arith.maximumf %31, %32 : vector<1x16x16x64xf32>
    %34 = vector.broadcast %27 : vector<1x1x1x64xf32> to vector<1x16x16x64xf32>
    %35 = arith.mulf %33, %34 : vector<1x16x16x64xf32>
    %36 = vector.broadcast %29 : vector<1x1x1x64xf32> to vector<1x16x16x64xf32>
    %37 = arith.addf %35, %36 : vector<1x16x16x64xf32>
    %c0_43 = arith.constant 0 : index
    %c1_44 = arith.constant 1 : index
    %c1_45 = arith.constant 1 : index
    %c0_46 = arith.constant 0 : index
    %38 = vector.load %arg6[%c0_43, %c1_44, %c1_45, %c0_46] : memref<1x18x18x64xf32, #tpu.memory_space<vmem>>, vector<1x16x16x64xf32>
    tpu.vector_store %arg6[%c0_43, %c1_44, %c1_45, %c0_46], %37 {strides = array<i32>} : memref<1x18x18x64xf32, #tpu.memory_space<vmem>>, vector<1x16x16x64xf32>,
    %c0_47 = arith.constant 0 : index
    %c0_48 = arith.constant 0 : index
    %c0_49 = arith.constant 0 : index
    %c0_50 = arith.constant 0 : index
    %39 = vector.load %arg6[%c0_47, %c0_48, %c0_49, %c0_50] : memref<1x18x18x64xf32, #tpu.memory_space<vmem>>, vector<1x18x16x64xf32>
    %40 = arith.truncf %39 : vector<1x18x16x64xf32> to vector<1x18x16x64xbf16>
    %c0_51 = arith.constant 0 : index
    %c0_52 = arith.constant 0 : index
    %c1_53 = arith.constant 1 : index
    %c0_54 = arith.constant 0 : index
    %41 = vector.load %arg6[%c0_51, %c0_52, %c1_53, %c0_54] : memref<1x18x18x64xf32, #tpu.memory_space<vmem>>, vector<1x18x16x64xf32>
    %42 = arith.truncf %41 : vector<1x18x16x64xf32> to vector<1x18x16x64xbf16>
    %c0_55 = arith.constant 0 : index
    %c0_56 = arith.constant 0 : index
    %c2_57 = arith.constant 2 : index
    %c0_58 = arith.constant 0 : index
    %43 = vector.load %arg6[%c0_55, %c0_56, %c2_57, %c0_58] : memref<1x18x18x64xf32, #tpu.memory_space<vmem>>, vector<1x18x16x64xf32>
    %44 = arith.truncf %43 : vector<1x18x16x64xf32> to vector<1x18x16x64xbf16>
    %45 = tpu.concatenate %40, %42, %44 in 3 : vector<1x18x16x64xbf16>, vector<1x18x16x64xbf16>, vector<1x18x16x64xbf16> -> vector<1x18x16x192xbf16>
    %46 = vector.shape_cast %45 : vector<1x18x16x192xbf16> to vector<288x192xbf16>
    %c0_59 = arith.constant 0 : index
    %c0_60 = arith.constant 0 : index
    %47 = vector.load %arg3[%c0_59, %c0_60] : memref<192x192xbf16, #tpu.memory_space<vmem>>, vector<192x192xbf16>
    %cst_61 = arith.constant dense<0.000000e+00> : vector<288x192xf32>
    %48 = tpu.matmul %46, %47, %cst_61 {dimension_numbers = #tpu.dot_dimension_numbers<[1], [0], [0], [1], [0, 0, 1, 1], [], []>} : vector<288x192xbf16>, vector<192x192xbf16>, vector<288x192xf32> -> vector<288x192xf32>
    %49 = vector.shape_cast %48 : vector<288x192xf32> to vector<1x18x16x192xf32>
    %50 = vector.extract_strided_slice %49 {offsets = [0, 0, 0, 0], sizes = [1, 16, 16, 64], strides = [1, 1, 1, 1]} : vector<1x18x16x192xf32> to vector<1x16x16x64xf32>
    %51 = vector.extract_strided_slice %49 {offsets = [0, 1, 0, 64], sizes = [1, 16, 16, 64], strides = [1, 1, 1, 1]} : vector<1x18x16x192xf32> to vector<1x16x16x64xf32>
    %52 = arith.addf %50, %51 : vector<1x16x16x64xf32>
    %53 = vector.extract_strided_slice %49 {offsets = [0, 2, 0, 128], sizes = [1, 16, 16, 64], strides = [1, 1, 1, 1]} : vector<1x18x16x192xf32> to vector<1x16x16x64xf32>
    %54 = arith.addf %52, %53 : vector<1x16x16x64xf32>
    %c3 = arith.constant 3 : index
    %c0_62 = arith.constant 0 : index
    %55 = vector.load %arg4[%c3, %c0_62] : memref<6x64xf32, #tpu.memory_space<vmem>>, vector<1x64xf32>
    %56 = vector.shape_cast %55 : vector<1x64xf32> to vector<1x1x1x64xf32>
    %c4 = arith.constant 4 : index
    %c0_63 = arith.constant 0 : index
    %57 = vector.load %arg4[%c4, %c0_63] : memref<6x64xf32, #tpu.memory_space<vmem>>, vector<1x64xf32>
    %58 = vector.shape_cast %57 : vector<1x64xf32> to vector<1x1x1x64xf32>
    %c5 = arith.constant 5 : index
    %c0_64 = arith.constant 0 : index
    %59 = vector.load %arg4[%c5, %c0_64] : memref<6x64xf32, #tpu.memory_space<vmem>>, vector<1x64xf32>
    %60 = vector.shape_cast %59 : vector<1x64xf32> to vector<1x1x1x64xf32>
    %61 = vector.broadcast %56 : vector<1x1x1x64xf32> to vector<1x16x16x64xf32>
    %62 = arith.addf %54, %61 : vector<1x16x16x64xf32>
    %cst_65 = arith.constant 0.000000e+00 : f32
    %63 = vector.broadcast %cst_65 : f32 to vector<1x16x16x64xf32>
    %64 = arith.maximumf %62, %63 : vector<1x16x16x64xf32>
    %65 = vector.broadcast %58 : vector<1x1x1x64xf32> to vector<1x16x16x64xf32>
    %66 = arith.mulf %64, %65 : vector<1x16x16x64xf32>
    %67 = vector.broadcast %60 : vector<1x1x1x64xf32> to vector<1x16x16x64xf32>
    %68 = arith.addf %66, %67 : vector<1x16x16x64xf32>
    %69 = vector.shape_cast %68 : vector<1x16x16x64xf32> to vector<1x16x1024xf32>
    %c0_66 = arith.constant 0 : index
    %c0_67 = arith.constant 0 : index
    %c0_68 = arith.constant 0 : index
    %70 = vector.load %arg5[%c0_66, %c0_67, %c0_68] : memref<1x16x1024xf32, #tpu.memory_space<vmem>>, vector<1x16x1024xf32>
    tpu.vector_store %arg5[%c0_66, %c0_67, %c0_68], %69 {strides = array<i32>} : memref<1x16x1024xf32, #tpu.memory_space<vmem>>, vector<1x16x1024xf32>,
    return
  }
  func.func @transform_0(%arg0: i32) -> (i32, i32, i32, i32) {
    %c0_i32 = arith.constant 0 : i32
    %c0_i32_0 = arith.constant 0 : i32
    %c0_i32_1 = arith.constant 0 : i32
    %c0_i32_2 = arith.constant 0 : i32
    return %arg0, %c0_i32, %c0_i32_0, %c0_i32_1 : i32, i32, i32, i32
  }
  func.func @transform_1(%arg0: i32) -> (i32, i32) {
    %c0_i32 = arith.constant 0 : i32
    %c0_i32_0 = arith.constant 0 : i32
    %c0_i32_1 = arith.constant 0 : i32
    return %c0_i32, %c0_i32_0 : i32, i32
  }
  func.func @transform_2(%arg0: i32) -> (i32, i32) {
    %c0_i32 = arith.constant 0 : i32
    %c0_i32_0 = arith.constant 0 : i32
    %c0_i32_1 = arith.constant 0 : i32
    return %c0_i32, %c0_i32_0 : i32, i32
  }
  func.func @transform_3(%arg0: i32) -> (i32, i32) {
    %c0_i32 = arith.constant 0 : i32
    %c0_i32_0 = arith.constant 0 : i32
    %c0_i32_1 = arith.constant 0 : i32
    return %c0_i32, %c0_i32_0 : i32, i32
  }
  func.func @transform_4(%arg0: i32) -> (i32, i32, i32) {
    %c0_i32 = arith.constant 0 : i32
    %c0_i32_0 = arith.constant 0 : i32
    %c0_i32_1 = arith.constant 0 : i32
    return %arg0, %c0_i32, %c0_i32_0 : i32, i32, i32
  }
}

</mosaic_0001>

<bundles_post_ra>
// kernel: local_features.1
= control target key start
LH: loop header
LB: loop body
LE: loop exit
PB: predicated region body
PF: predicated region fallthrough
CT: control target
= control target key end

     0   :  { %s3307_s15 = smov 0   ;;  %s4865_s0 = inlined_call_operand.vmem [shape: f32[2,16,16,64], index: 0, kind: input, shape index: {}]   ;;  %s4866_s1 = inlined_call_operand.vmem [shape: bf16[192,192], index: 1, kind: input, shape index: {}]   ;;  %s4867_s2 = inlined_call_operand.vmem [shape: bf16[192,192], index: 2, kind: input, shape index: {}]   ;;  %s4868_s3 = inlined_call_operand.vmem [shape: f32[6,64], index: 3, kind: input, shape index: {}]   ;;  %s4869_s4 = inlined_call_operand.vmem [shape: f32[2,16,1024], index: 4, kind: output, shape index: {}]  }
   0x1 LB: > { %s3093_s16 = sadd.s32 4294967295, %s3276_s15   ;;  %p3097_p0 = scmp.ge.s32.totalorder %s3276_s15, 1  ;;  %s3276_s15 = sphi %s3307_s15, %s14_s15  }
   0x2   : > { %p162_p1 = scmp.lt.s32.totalorder %s3276_s15, 3 }
   0x4   : > { %p163_p2 = pnand %p3097_p0, %p162_p1 }
   0x6   : > { %166 = sbr.rel (%p163_p2) target bundleno = 1296 (0x510), region = 36 }
   0xd   : > { %vm199_vm0 = vcmask 523264   ;;  %vm202_vm1 = vcmask 517120   ;;  %p188_p3 = scmp.lt.s32.totalorder %s3093_s16, 1  ;;  %v3278_v0 = vmov 0.0   ;;  %v3208_v1 = vld [vmem:[%s4866_s1 + $0x4] ss:$8 sps:$4 sm:$0xff]  }
   0xe   : > { %200 = vst.msk [vmem:[#allocation2] sm:$0xff] %vm199_vm0, %v3278_v0  ;;  %201 = vst.msk [vmem:[#allocation2 + $0x8] sm:$0xff] %vm199_vm0, %v3278_v0  ;;  %v3210_v2 = vld [vmem:[%s4866_s1] ss:$8 sps:$4 sm:$0xff]   ;;  %vm208_vm2 = vcmask 516096   ;;  %v3330_v3 = vld [vmem:[%s4866_s1 + $0x10] sm:$0xff]  ;;  %796 = vmatprep.subr.bf16.mxu0 %v3208_v1 }
   0xf   : > { %203 = vst.msk [vmem:[#allocation2 + $0x10] sm:$0x3] %vm202_vm1, %v3278_v0  ;;  %207 = vst.msk [vmem:[#allocation2 + $0x1a8] sm:$0x3] %vm202_vm1, %v3278_v0  ;;  %s4918_s16 = smov (!%p188_p3, %s3093_s16), 1  ;;  %v3335_v4 = vld [vmem:[%s4866_s1 + $0x18] sm:$0xff]  ;;  %797 = vmatpush1.bf16.msra.mxu0 %v3210_v2 }
  0x10   : > { %205 = vst.msk [vmem:[#allocation2 + $0x198] sm:$0xff] %vm199_vm0, %v3278_v0  ;;  %206 = vst.msk [vmem:[#allocation2 + $0x1a0] sm:$0xff] %vm199_vm0, %v3278_v0  ;;  %v3211_v5 = vld [vmem:[%s4866_s1 + $0x14] ss:$8 sps:$4 sm:$0xff]   ;;  %s3194_s27 = sshll.u32 %s4918_s16, 8  ;;  %v3104_v6 = vcombine.low %v3330_v3, %v3335_v4  ;;  %s3279_s17 = smov 64  }
  0x11   : > { %227 = vst.msk [vmem:[#allocation2 + $0x11] sm:$0x1] %vm208_vm2, %v3278_v0  ;;  %209 = vst.msk [vmem:[#allocation2] sm:$0x1] %vm208_vm2, %v3278_v0  ;;  %s3382_s30 = scalar_lea.vmem %s4865_s0, %s3194_s27  ;;  %798 = vmatprep.subr.bf16.mxu0 %v3211_v5  ;;  %v3213_v7 = vld [vmem:[%s4866_s1 + $0x24] ss:$8 sps:$4 sm:$0xff]  }
  0x12   : > { %210 = vst.msk [vmem:[#allocation2 + $0x18] sm:$0x1] %vm208_vm2, %v3278_v0  ;;  %211 = vst.msk [vmem:[#allocation2 + $0x30] sm:$0x1] %vm208_vm2, %v3278_v0  ;;  %v245_v8 = vld [vmem:[%s3382_s30] sm:$0xff]  ;;  %v246_v9 = vld [vmem:[%s3382_s30 + $0x8] sm:$0xff] }
  0x13   : > { %212 = vst.msk [vmem:[#allocation2 + $0x48] sm:$0x1] %vm208_vm2, %v3278_v0  ;;  %213 = vst.msk [vmem:[#allocation2 + $0x60] sm:$0x1] %vm208_vm2, %v3278_v0  ;;  %v247_v10 = vld [vmem:[%s3382_s30 + $0x10] sm:$0xff]  ;;  %v248_v12 = vld [vmem:[%s3382_s30 + $0x18] sm:$0xff]  ;;  %799 = vmatpush1.bf16.msra.mxu0 %v3104_v6 }
  0x14   : > { %214 = vst.msk [vmem:[#allocation2 + $0x78] sm:$0x1] %vm208_vm2, %v3278_v0  ;;  %215 = vst.msk [vmem:[#allocation2 + $0x90] sm:$0x1] %vm208_vm2, %v3278_v0  ;;  %v3215_v11 = vld [vmem:[%s4866_s1 + $0x20] ss:$8 sps:$4 sm:$0xff]   ;;  %800 = vmatprep.subr.bf16.mxu0 %v3213_v7 }
  0x15   : > { %216 = vst.msk [vmem:[#allocation2 + $0xa8] sm:$0x1] %vm208_vm2, %v3278_v0  ;;  %217 = vst.msk [vmem:[#allocation2 + $0xc0] sm:$0x1] %vm208_vm2, %v3278_v0  ;;  %v249_v13 = vld [vmem:[%s3382_s30 + $0x20] sm:$0xff]  ;;  %v250_v14 = vld [vmem:[%s3382_s30 + $0x28] sm:$0xff] }
  0x16   : > { %218 = vst.msk [vmem:[#allocation2 + $0xd8] sm:$0x1] %vm208_vm2, %v3278_v0  ;;  %219 = vst.msk [vmem:[#allocation2 + $0xf0] sm:$0x1] %vm208_vm2, %v3278_v0  ;;  %v604_v15 = vld [vmem:[%s4866_s1 + $0x30] sm:$0xff]  ;;  %v605_v16 = vld [vmem:[%s4866_s1 + $0x38] sm:$0xff] }
  0x17   : > { %220 = vst.msk [vmem:[#allocation2 + $0x108] sm:$0x1] %vm208_vm2, %v3278_v0  ;;  %221 = vst.msk [vmem:[#allocation2 + $0x120] sm:$0x1] %vm208_vm2, %v3278_v0  ;;  %v3216_v17 = vld [vmem:[%s4866_s1 + $0x34] ss:$8 sps:$4 sm:$0xff]   ;;  %801 = vmatpush1.bf16.msra.mxu0 %v3215_v11  ;;  %v3108_v34 = vcombine.low %v604_v15, %v605_v16 }
  0x18   : > { %222 = vst.msk [vmem:[#allocation2 + $0x138] sm:$0x1] %vm208_vm2, %v3278_v0  ;;  %223 = vst.msk [vmem:[#allocation2 + $0x150] sm:$0x1] %vm208_vm2, %v3278_v0  ;;  %v364_v18 = vld [vmem:[#allocation2 + $0x1] sm:$0xff]  ;;  %v365_v19 = vld [vmem:[#allocation2 + $0x9] sm:$0xff]  ;;  %802 = vmatprep.subr.bf16.mxu0 %v3216_v17 }
  0x19   : > { %224 = vst.msk [vmem:[#allocation2 + $0x168] sm:$0x1] %vm208_vm2, %v3278_v0  ;;  %225 = vst.msk [vmem:[#allocation2 + $0x180] sm:$0x1] %vm208_vm2, %v3278_v0  ;;  %v251_v20 = vld [vmem:[%s3382_s30 + $0x30] sm:$0xff]  ;;  %v3412_v21 = vpack.c.bf16 %v365_v19, %v364_v18  ;;  %v252_v22 = vld [vmem:[%s3382_s30 + $0x38] sm:$0xff] }
  0x1a   : > { %226 = vst.msk [vmem:[#allocation2 + $0x198] sm:$0x1] %vm208_vm2, %v3278_v0  ;;  %228 = vst.msk [vmem:[#allocation2 + $0x29] sm:$0x1] %vm208_vm2, %v3278_v0  ;;  %v253_v23 = vld [vmem:[%s3382_s30 + $0x40] sm:$0xff]  ;;  %v254_v24 = vld [vmem:[%s3382_s30 + $0x48] sm:$0xff] }
  0x1b   : > { %229 = vst.msk [vmem:[#allocation2 + $0x41] sm:$0x1] %vm208_vm2, %v3278_v0  ;;  %230 = vst.msk [vmem:[#allocation2 + $0x59] sm:$0x1] %vm208_vm2, %v3278_v0  ;;  %v255_v25 = vld [vmem:[%s3382_s30 + $0x50] sm:$0xff]  ;;  %v256_v26 = vld [vmem:[%s3382_s30 + $0x58] sm:$0xff]  ;;  %490 = vrot.lane.b32.xlu0 %v3412_v21, %s3279_s17  ;;  %803 = vmatpush1.bf16.msra.mxu0 %v3108_v34 }
  0x1c   : > { %231 = vst.msk [vmem:[#allocation2 + $0x71] sm:$0x1] %vm208_vm2, %v3278_v0  ;;  %232 = vst.msk [vmem:[#allocation2 + $0x89] sm:$0x1] %vm208_vm2, %v3278_v0  ;;  %v257_v27 = vld [vmem:[%s3382_s30 + $0x60] sm:$0xff]  ;;  %v258_v28 = vld [vmem:[%s3382_s30 + $0x68] sm:$0xff] }
  0x1d   : > { %233 = vst.msk [vmem:[#allocation2 + $0xa1] sm:$0x1] %vm208_vm2, %v3278_v0  ;;  %234 = vst.msk [vmem:[#allocation2 + $0xb9] sm:$0x1] %vm208_vm2, %v3278_v0  ;;  %v259_v29 = vld [vmem:[%s3382_s30 + $0x70] sm:$0xff]  ;;  %v260_v30 = vld [vmem:[%s3382_s30 + $0x78] sm:$0xff] }
  0x1e   : > { %235 = vst.msk [vmem:[#allocation2 + $0xd1] sm:$0x1] %vm208_vm2, %v3278_v0  ;;  %236 = vst.msk [vmem:[#allocation2 + $0xe9] sm:$0x1] %vm208_vm2, %v3278_v0  ;;  %v261_v31 = vld [vmem:[%s3382_s30 + $0x80] sm:$0xff]  ;;  %v262_v32 = vld [vmem:[%s3382_s30 + $0x88] sm:$0xff] }
  0x1f   : > { %237 = vst.msk [vmem:[#allocation2 + $0x101] sm:$0x1] %vm208_vm2, %v3278_v0  ;;  %238 = vst.msk [vmem:[#allocation2 + $0x119] sm:$0x1] %vm208_vm2, %v3278_v0  ;;  %v263_v33 = vld [vmem:[%s3382_s30 + $0x90] sm:$0xff]  ;;  %v264_v35 = vld [vmem:[%s3382_s30 + $0x98] sm:$0xff] }
  0x20   : > { %239 = vst.msk [vmem:[#allocation2 + $0x131] sm:$0x1] %vm208_vm2, %v3278_v0  ;;  %240 = vst.msk [vmem:[#allocation2 + $0x149] sm:$0x1] %vm208_vm2, %v3278_v0  ;;  %v3218_v36 = vld [vmem:[%s4866_s1 + $0x44] ss:$8 sps:$4 sm:$0xff]  }
  0x21   : > { %241 = vst.msk [vmem:[#allocation2 + $0x161] sm:$0x1] %vm208_vm2, %v3278_v0  ;;  %242 = vst.msk [vmem:[#allocation2 + $0x179] sm:$0x1] %vm208_vm2, %v3278_v0  ;;  %v3220_v46 = vld [vmem:[%s4866_s1 + $0x40] ss:$8 sps:$4 sm:$0xff]   ;;  %804 = vmatprep.subr.bf16.mxu0 %v3218_v36 }
  0x22   : > { %243 = vst.msk [vmem:[#allocation2 + $0x191] sm:$0x1] %vm208_vm2, %v3278_v0  ;;  %244 = vst.msk [vmem:[#allocation2 + $0x1a9] sm:$0x1] %vm208_vm2, %v3278_v0  ;;  %v608_v48 = vld [vmem:[%s4866_s1 + $0x50] sm:$0xff]  ;;  %v609_v49 = vld [vmem:[%s4866_s1 + $0x58] sm:$0xff]  ;;  %805 = vmatpush1.bf16.msra.mxu0 %v3220_v46 }
  0x23   : > { %278 = vst.msk [vmem:[#allocation2 + $0x19] sm:$0xff] %vm199_vm0, %v245_v8  ;;  %279 = vst.msk [vmem:[#allocation2 + $0x21] sm:$0xff] %vm199_vm0, %v246_v9  ;;  %v3112_v57 = vcombine.low %v608_v48, %v609_v49  ;;  %v3221_v62 = vld [vmem:[%s4866_s1 + $0x54] ss:$8 sps:$4 sm:$0xff]   ;;  %v265_v63 = vld [vmem:[%s3382_s30 + $0xa0] sm:$0xff]  ;;  %s3195_s9 = sshll.u32 %s4918_s16, 7 }
  0x24   : > { %280 = vst.msk [vmem:[#allocation2 + $0x31] sm:$0xff] %vm199_vm0, %v247_v10  ;;  %281 = vst.msk [vmem:[#allocation2 + $0x39] sm:$0xff] %vm199_vm0, %v248_v12  ;;  %v266_v1 = vld [vmem:[%s3382_s30 + $0xa8] sm:$0xff]  ;;  %806 = vmatprep.subr.bf16.mxu0 %v3221_v62  ;;  %v612_v4 = vld [vmem:[%s4866_s1 + $0x70] sm:$0xff]  ;;  %s4742_s11 = scalar_lea.vmem %s4869_s4, %s3195_s9 }
  0x25   : > { %282 = vst.msk [vmem:[#allocation2 + $0x49] sm:$0xff] %vm199_vm0, %v249_v13  ;;  %283 = vst.msk [vmem:[#allocation2 + $0x51] sm:$0xff] %vm199_vm0, %v250_v14  ;;  %v3223_v2 = vld [vmem:[%s4866_s1 + $0x64] ss:$8 sps:$4 sm:$0xff]   ;;  %v3225_v3 = vld [vmem:[%s4866_s1 + $0x60] ss:$8 sps:$4 sm:$0xff]  }
  0x26   : > { %284 = vst.msk [vmem:[#allocation2 + $0x61] sm:$0xff] %vm199_vm0, %v251_v20  ;;  %285 = vst.msk [vmem:[#allocation2 + $0x69] sm:$0xff] %vm199_vm0, %v252_v22  ;;  %807 = vmatpush1.bf16.msra.mxu0 %v3112_v57  ;;  %v613_v5 = vld [vmem:[%s4866_s1 + $0x78] sm:$0xff]  ;;  %v267_v7 = vld [vmem:[%s3382_s30 + $0xb0] sm:$0xff] }
  0x27   : > { %286 = vst.msk [vmem:[#allocation2 + $0x79] sm:$0xff] %vm199_vm0, %v253_v23  ;;  %287 = vst.msk [vmem:[#allocation2 + $0x81] sm:$0xff] %vm199_vm0, %v254_v24  ;;  %v3226_v6 = vld [vmem:[%s4866_s1 + $0x74] ss:$8 sps:$4 sm:$0xff]   ;;  %808 = vmatprep.subr.bf16.mxu0 %v3223_v2  ;;  %v3116_v15 = vcombine.low %v612_v4, %v613_v5  ;;  %v3228_v17 = vld [vmem:[%s4866_s1 + $0x84] ss:$8 sps:$4 sm:$0xff]  }
  0x28   : > { %288 = vst.msk [vmem:[#allocation2 + $0x91] sm:$0xff] %vm199_vm0, %v255_v25  ;;  %289 = vst.msk [vmem:[#allocation2 + $0x99] sm:$0xff] %vm199_vm0, %v256_v26  ;;  %v268_v9 = vld [vmem:[%s3382_s30 + $0xb8] sm:$0xff]  ;;  %v418_v22 = vld [vmem:[#allocation2 + $0x2] sm:$0xff] }
  0x29   : > { %290 = vst.msk [vmem:[#allocation2 + $0xa9] sm:$0xff] %vm199_vm0, %v257_v27  ;;  %291 = vst.msk [vmem:[#allocation2 + $0xb1] sm:$0xff] %vm199_vm0, %v258_v28  ;;  %v419_v23 = vld [vmem:[#allocation2 + $0xa] sm:$0xff]  ;;  %v3231_v28 = vld [vmem:[%s4866_s1 + $0x94] ss:$8 sps:$4 sm:$0xff]  }
  0x2a   : > { %292 = vst.msk [vmem:[#allocation2 + $0xc1] sm:$0xff] %vm199_vm0, %v259_v29  ;;  %293 = vst.msk [vmem:[#allocation2 + $0xc9] sm:$0xff] %vm199_vm0, %v260_v30  ;;  %v366_v37 = vld [vmem:[#allocation2 + $0x19] sm:$0xff]  ;;  %v367_v38 = vld [vmem:[#allocation2 + $0x21] sm:$0xff]  ;;  %809 = vmatpush1.bf16.msra.mxu0 %v3225_v3  ;;  %v454_v26 = vpack.c.bf16 %v419_v23, %v418_v22 }
  0x2b   : > { %294 = vst.msk [vmem:[#allocation2 + $0xd9] sm:$0xff] %vm199_vm0, %v261_v31  ;;  %295 = vst.msk [vmem:[#allocation2 + $0xe1] sm:$0xff] %vm199_vm0, %v262_v32  ;;  %v368_v39 = vld [vmem:[#allocation2 + $0x31] sm:$0xff]  ;;  %v401_v40 = vpack.c.bf16 %v367_v38, %v366_v37  ;;  %v369_v41 = vld [vmem:[#allocation2 + $0x39] sm:$0xff]  ;;  %810 = vmatprep.subr.bf16.mxu0 %v3226_v6 }
  0x2c   : > { %296 = vst.msk [vmem:[#allocation2 + $0xf1] sm:$0xff] %vm199_vm0, %v263_v33  ;;  %297 = vst.msk [vmem:[#allocation2 + $0xf9] sm:$0xff] %vm199_vm0, %v264_v35  ;;  %v370_v42 = vld [vmem:[#allocation2 + $0x49] sm:$0xff]  ;;  %v371_v43 = vld [vmem:[#allocation2 + $0x51] sm:$0xff]  ;;  %v402_v44 = vpack.c.bf16 %v369_v41, %v368_v39  ;;  %3126 = vmatprep.mubr.msk.bf16.mxu0 %vm199_vm0, %v454_v26 }
  0x2d   : > { %v372_v45 = vld [vmem:[#allocation2 + $0x61] sm:$0xff]  ;;  %492 = vrot.lane.b32.xlu0 %v401_v40, %s3279_s17  ;;  %v373_v47 = vld [vmem:[#allocation2 + $0x69] sm:$0xff]  ;;  %v403_v50 = vpack.c.bf16 %v371_v43, %v370_v42  ;;  %298 = vst.msk [vmem:[#allocation2 + $0x109] sm:$0xff] %vm199_vm0, %v265_v63  ;;  %299 = vst.msk [vmem:[#allocation2 + $0x111] sm:$0xff] %vm199_vm0, %v266_v1 }
  0x2e   : > { %494 = vrot.lane.b32.xlu1 %v402_v44, %s3279_s17  ;;  %v404_v51 = vpack.c.bf16 %v373_v47, %v372_v45  ;;  %v374_v54 = vld [vmem:[#allocation2 + $0x79] sm:$0xff]  ;;  %v375_v55 = vld [vmem:[#allocation2 + $0x81] sm:$0xff]  ;;  %300 = vst.msk [vmem:[#allocation2 + $0x121] sm:$0xff] %vm199_vm0, %v267_v7  ;;  %301 = vst.msk [vmem:[#allocation2 + $0x129] sm:$0xff] %vm199_vm0, %v268_v9  ;;  %811 = vmatpush1.bf16.msra.mxu0 %v3116_v15 }
  0x2f   : > { %v376_v52 = vld [vmem:[#allocation2 + $0x91] sm:$0xff]  ;;  %v377_v53 = vld [vmem:[#allocation2 + $0x99] sm:$0xff]  ;;  %v405_v0 = vpack.c.bf16 %v375_v55, %v374_v54  ;;  %812 = vmatprep.subr.bf16.mxu0 %v3228_v17  ;;  %v3234_v32 = vld [vmem:[%s4866_s1 + $0xa4] ss:$8 sps:$4 sm:$0xff]  }
  0x30   : > { %v406_v58 = vpack.c.bf16 %v377_v53, %v376_v52  ;;  %v378_v59 = vld [vmem:[#allocation2 + $0xa9] sm:$0xff]  ;;  %v379_v60 = vld [vmem:[#allocation2 + $0xb1] sm:$0xff]  ;;  %v269_v33 = vld [vmem:[%s3382_s30 + $0xc0] sm:$0xff] }
  0x31   : > { %v380_v56 = vld [vmem:[#allocation2 + $0xc1] sm:$0xff]  ;;  %498 = vrot.lane.b32.xlu0 %v404_v51, %s3279_s17  ;;  %v381_v61 = vld [vmem:[#allocation2 + $0xc9] sm:$0xff]  ;;  %v407_v10 = vpack.c.bf16 %v379_v60, %v378_v59  ;;  %302 = vst.msk [vmem:[#allocation2 + $0x139] sm:$0xff] %vm199_vm0, %v269_v33  ;;  %v3237_v37 = vld [vmem:[%s4866_s1 + $0xb4] ss:$8 sps:$4 sm:$0xff]  }
  0x32   : > { %496 = vrot.lane.b32.xlu1 %v403_v50, %s3279_s17  ;;  %v408_v8 = vpack.c.bf16 %v381_v61, %v380_v56  ;;  %v382_v13 = vld [vmem:[#allocation2 + $0xd9] sm:$0xff]  ;;  %v383_v14 = vld [vmem:[#allocation2 + $0xe1] sm:$0xff]  ;;  %v271_v36 = vld [vmem:[%s3382_s30 + $0xd0] sm:$0xff] }
  0x33   : > { %v384_v11 = vld [vmem:[#allocation2 + $0xf1] sm:$0xff]  ;;  %v385_v12 = vld [vmem:[#allocation2 + $0xf9] sm:$0xff]  ;;  %v409_v18 = vpack.c.bf16 %v383_v14, %v382_v13  ;;  %v270_v34 = vld [vmem:[%s3382_s30 + $0xc8] sm:$0xff]  ;;  %304 = vst.msk [vmem:[#allocation2 + $0x151] sm:$0xff] %vm199_vm0, %v271_v36 }
  0x34   : > { %v410_v16 = vpack.c.bf16 %v385_v12, %v384_v11  ;;  %v386_v19 = vld [vmem:[#allocation2 + $0x109] sm:$0xff]  ;;  %v387_v20 = vld [vmem:[#allocation2 + $0x111] sm:$0xff]  ;;  %303 = vst.msk [vmem:[#allocation2 + $0x141] sm:$0xff] %vm199_vm0, %v270_v34  ;;  %v273_v40 = vld [vmem:[%s3382_s30 + $0xe0] sm:$0xff] }
  0x35   : > { %502 = vrot.lane.b32.xlu0 %v406_v58, %s3279_s17  ;;  %v388_v24 = vld [vmem:[#allocation2 + $0x121] sm:$0xff]  ;;  %v389_v27 = vld [vmem:[#allocation2 + $0x129] sm:$0xff]  ;;  %v411_v29 = vpack.c.bf16 %v387_v20, %v386_v19  ;;  %v272_v38 = vld [vmem:[%s3382_s30 + $0xd8] sm:$0xff]  ;;  %306 = vst.msk [vmem:[#allocation2 + $0x169] sm:$0xff] %vm199_vm0, %v273_v40 }
  0x36   : > { %500 = vrot.lane.b32.xlu1 %v405_v0, %s3279_s17  ;;  %v3230_v25 = vld [vmem:[%s4866_s1 + $0x80] ss:$8 sps:$4 sm:$0xff]   ;;  %v412_v30 = vpack.c.bf16 %v389_v27, %v388_v24  ;;  %v3233_v31 = vld [vmem:[%s4866_s1 + $0x90] ss:$8 sps:$4 sm:$0xff]   ;;  %305 = vst.msk [vmem:[#allocation2 + $0x159] sm:$0xff] %vm199_vm0, %v272_v38 }
  0x37   : > { %813 = vmatpush1.bf16.msra.mxu0 %v3230_v25  ;;  %v3236_v35 = vld [vmem:[%s4866_s1 + $0xa0] ss:$8 sps:$4 sm:$0xff]   ;;  %v3239_v39 = vld [vmem:[%s4866_s1 + $0xb0] ss:$8 sps:$4 sm:$0xff]  }
  0x38   : > { %814 = vmatprep.subr.bf16.mxu0 %v3231_v28  ;;  %v274_v41 = vld [vmem:[%s3382_s30 + $0xe8] sm:$0xff]  ;;  %v390_v42 = vld [vmem:[#allocation2 + $0x139] sm:$0xff]  ;;  %v275_v49 = vld [vmem:[%s3382_s30 + $0xf0] sm:$0xff] }
  0x39   : > { %506 = vrot.lane.b32.xlu0 %v408_v8, %s3279_s17  ;;  %307 = vst.msk [vmem:[#allocation2 + $0x171] sm:$0xff] %vm199_vm0, %v274_v41  ;;  %v276_v50 = vld [vmem:[%s3382_s30 + $0xf8] sm:$0xff]  ;;  %308 = vst.msk [vmem:[#allocation2 + $0x181] sm:$0xff] %vm199_vm0, %v275_v49  ;;  %v310_v56 = vld [vmem:[#allocation2] sm:$0xff] }
  0x3a   : > { %504 = vrot.lane.b32.xlu1 %v407_v10, %s3279_s17  ;;  %v392_v45 = vld [vmem:[#allocation2 + $0x151] sm:$0xff]  ;;  %309 = vst.msk [vmem:[#allocation2 + $0x189] sm:$0xff] %vm199_vm0, %v276_v50  ;;  %v311_v57 = vld [vmem:[#allocation2 + $0x8] sm:$0xff]  ;;  %v398_v58 = vld [vmem:[#allocation2 + $0x199] sm:$0xff] }
  0x3b   : > { %815 = vmatpush1.bf16.msra.mxu0 %v3233_v31  ;;  %v391_v43 = vld [vmem:[#allocation2 + $0x141] sm:$0xff]  ;;  %v346_v63 = vpack.c.bf16 %v311_v57, %v310_v56  ;;  %v312_v2 = vld [vmem:[#allocation2 + $0x18] sm:$0xff]  ;;  %v314_v11 = vld [vmem:[#allocation2 + $0x30] sm:$0xff] }
  0x3c   : > { %816 = vmatprep.subr.bf16.mxu0 %v3234_v32  ;;  %v413_v44 = vpack.c.bf16 %v391_v43, %v390_v42  ;;  %v394_v48 = vld [vmem:[#allocation2 + $0x169] sm:$0xff]  ;;  %v399_v59 = vld [vmem:[#allocation2 + $0x1a1] sm:$0xff]  ;;  %v422_v6 = vld [vmem:[#allocation2 + $0x32] sm:$0xff] }
  0x3d   : > { %510 = vrot.lane.b32.xlu0 %v410_v16, %s3279_s17  ;;  %v393_v46 = vld [vmem:[#allocation2 + $0x159] sm:$0xff]  ;;  %v421_v61 = vld [vmem:[#allocation2 + $0x22] sm:$0xff]  ;;  %v417_v62 = vpack.c.bf16 %v399_v59, %v398_v58  ;;  %v424_v15 = vld [vmem:[#allocation2 + $0x4a] sm:$0xff] }
  0x3e   : > { %508 = vrot.lane.b32.xlu1 %v409_v18, %s3279_s17  ;;  %v414_v47 = vpack.c.bf16 %v393_v46, %v392_v45  ;;  %v420_v60 = vld [vmem:[#allocation2 + $0x1a] sm:$0xff]  ;;  %v425_v16 = vld [vmem:[#allocation2 + $0x52] sm:$0xff]  ;;  %v316_v19 = vld [vmem:[#allocation2 + $0x48] sm:$0xff] }
  0x3f   : > { %817 = vmatpush1.bf16.msra.mxu0 %v3236_v35  ;;  %v455_v0 = vpack.c.bf16 %v421_v61, %v420_v60  ;;  %v313_v3 = vld [vmem:[#allocation2 + $0x20] sm:$0xff]  ;;  %v315_v12 = vld [vmem:[#allocation2 + $0x38] sm:$0xff]  ;;  %v457_v18 = vpack.c.bf16 %v425_v16, %v424_v15  ;;  %v317_v20 = vld [vmem:[#allocation2 + $0x50] sm:$0xff] }
  0x40   : > { %818 = vmatprep.subr.bf16.mxu0 %v3237_v37  ;;  %v395_v51 = vld [vmem:[#allocation2 + $0x171] sm:$0xff]  ;;  %v396_v53 = vld [vmem:[#allocation2 + $0x181] sm:$0xff]  ;;  %v347_v5 = vpack.c.bf16 %v313_v3, %v312_v2  ;;  %v348_v13 = vpack.c.bf16 %v315_v12, %v314_v11  ;;  %v349_v22 = vpack.c.bf16 %v317_v20, %v316_v19 }
  0x41   : > { %514 = vrot.lane.b32.xlu0 %v412_v30, %s3279_s17  ;;  %v415_v52 = vpack.c.bf16 %v395_v51, %v394_v48  ;;  %v397_v54 = vld [vmem:[#allocation2 + $0x189] sm:$0xff]  ;;  %v423_v7 = vld [vmem:[#allocation2 + $0x3a] sm:$0xff]  ;;  %v430_v40 = vld [vmem:[#allocation2 + $0x92] sm:$0xff] }
  0x42   : > { %512 = vrot.lane.b32.xlu1 %v411_v29, %s3279_s17  ;;  %v416_v55 = vpack.c.bf16 %v397_v54, %v396_v53  ;;  %v456_v10 = vpack.c.bf16 %v423_v7, %v422_v6  ;;  %v426_v24 = vld [vmem:[#allocation2 + $0x62] sm:$0xff]  ;;  %v427_v25 = vld [vmem:[#allocation2 + $0x6a] sm:$0xff]  ;;  %v428_v32 = vld [vmem:[#allocation2 + $0x7a] sm:$0xff] }
  0x43   : > { %819 = vmatpush1.bf16.msra.mxu0 %v3239_v39  ;;  %v458_v27 = vpack.c.bf16 %v427_v25, %v426_v24  ;;  %v318_v28 = vld [vmem:[#allocation2 + $0x60] sm:$0xff]  ;;  %v319_v29 = vld [vmem:[#allocation2 + $0x68] sm:$0xff]  ;;  %v320_v36 = vld [vmem:[#allocation2 + $0x78] sm:$0xff] }
  0x44   : > { %v350_v30 = vpack.c.bf16 %v319_v29, %v318_v28  ;;  %v429_v33 = vld [vmem:[#allocation2 + $0x82] sm:$0xff]  ;;  %v431_v41 = vld [vmem:[#allocation2 + $0x9a] sm:$0xff]  ;;  %v432_v48 = vld [vmem:[#allocation2 + $0xaa] sm:$0xff] }
  0x45   : > { %518 = vrot.lane.b32.xlu0 %v414_v47, %s3279_s17  ;;  %v459_v35 = vpack.c.bf16 %v429_v33, %v428_v32  ;;  %v321_v37 = vld [vmem:[#allocation2 + $0x80] sm:$0xff]  ;;  %v460_v43 = vpack.c.bf16 %v431_v41, %v430_v40  ;;  %v323_v45 = vld [vmem:[#allocation2 + $0x98] sm:$0xff]  ;;  %v325_v53 = vld [vmem:[#allocation2 + $0xb0] sm:$0xff] }
  0x46   : > { %516 = vrot.lane.b32.xlu1 %v413_v44, %s3279_s17  ;;  %v351_v38 = vpack.c.bf16 %v321_v37, %v320_v36  ;;  %v322_v44 = vld [vmem:[#allocation2 + $0x90] sm:$0xff]  ;;  %v434_v56 = vld [vmem:[#allocation2 + $0xc2] sm:$0xff]  ;;  %v444_v33 = vld [vmem:[#allocation2 + $0x13a] sm:$0xff] }
  0x47   : > { %v352_v46 = vpack.c.bf16 %v323_v45, %v322_v44  ;;  %v433_v49 = vld [vmem:[#allocation2 + $0xb2] sm:$0xff]  ;;  %v435_v57 = vld [vmem:[#allocation2 + $0xca] sm:$0xff]  ;;  %v326_v60 = vld [vmem:[#allocation2 + $0xc0] sm:$0xff] }
  0x48   : > { %v461_v51 = vpack.c.bf16 %v433_v49, %v432_v48  ;;  %v462_v59 = vpack.c.bf16 %v435_v57, %v434_v56  ;;  %v327_v61 = vld [vmem:[#allocation2 + $0xc8] sm:$0xff]  ;;  %v330_v12 = vld [vmem:[#allocation2 + $0xf0] sm:$0xff]  ;;  %v334_v29 = vld [vmem:[#allocation2 + $0x120] sm:$0xff] }
  0x49   : > { %522 = vrot.lane.b32.xlu0 %v416_v55, %s3279_s17  ;;  %v440_v16 = vld [vmem:[#allocation2 + $0x10a] sm:$0xff]  ;;  %v442_v25 = vld [vmem:[#allocation2 + $0x122] sm:$0xff]  ;;  %v336_v37 = vld [vmem:[#allocation2 + $0x138] sm:$0xff] }
  0x4a   : > { %520 = vrot.lane.b32.xlu1 %v415_v52, %s3279_s17  ;;  %v324_v52 = vld [vmem:[#allocation2 + $0xa8] sm:$0xff]  ;;  %v446_v41 = vld [vmem:[#allocation2 + $0x152] sm:$0xff] }
  0x4b   : > { %v353_v54 = vpack.c.bf16 %v325_v53, %v324_v52  ;;  %v332_v20 = vld [vmem:[#allocation2 + $0x108] sm:$0xff]  ;;  %v338_v45 = vld [vmem:[#allocation2 + $0x150] sm:$0xff] }
  0x4c   : > { %v448_v49 = vld [vmem:[#allocation2 + $0x16a] sm:$0xff]  ;;  %v450_v57 = vld [vmem:[#allocation2 + $0x182] sm:$0xff] }
  0x4d   : > { %v340_v53 = vld [vmem:[#allocation2 + $0x168] sm:$0xff] }
  0x4e   : > { %524 = vrot.lane.b32.xlu1 %v417_v62, %s3279_s17  ;;  %v354_v62 = vpack.c.bf16 %v327_v61, %v326_v60  ;;  %v342_v61 = vld [vmem:[#allocation2 + $0x180] sm:$0xff] }
  0x8d   : > { %v491_v1 = vpop.permute.xlu0 %490 }
  0x8e   : > { %v528_v4 = vsel %vm199_vm0, %v346_v63, %v491_v1  ;;  %v437_v1 = vld [vmem:[#allocation2 + $0xe2] sm:$0xff] }
  0x8f   : > { %829 = vmatmul.mubr.bf16.vlgmr.msra.gmra.mrb[0].mxu0 %v528_v4  ;;  %v328_v4 = vld [vmem:[#allocation2 + $0xd8] sm:$0xff] }
  0x90   : > { %3127 = vmatprep.mubr.msk.bf16.mxu0 %vm199_vm0, %v455_v0  ;;  %v436_v0 = vld [vmem:[#allocation2 + $0xda] sm:$0xff] }
  0x91   : > { %v463_v3 = vpack.c.bf16 %v437_v1, %v436_v0 }
  0x9f   : > { %v493_v8 = vpop.permute.xlu0 %492 }
  0xa0   : > { %v532_v9 = vsel %vm199_vm0, %v347_v5, %v493_v8  ;;  %v495_v14 = vpop.permute.xlu1 %494  ;;  %v329_v5 = vld [vmem:[#allocation2 + $0xe0] sm:$0xff]  ;;  %v438_v8 = vld [vmem:[#allocation2 + $0xf2] sm:$0xff] }
  0xa1   : > { %837 = vmatmul.mubr.bf16.gmra.mrb[4].mxu0 %v532_v9  ;;  %v536_v17 = vsel %vm199_vm0, %v348_v13, %v495_v14  ;;  %v355_v6 = vpack.c.bf16 %v329_v5, %v328_v4  ;;  %v439_v9 = vld [vmem:[#allocation2 + $0xfa] sm:$0xff] }
  0xa2   : > { %3128 = vmatprep.mubr.msk.bf16.mxu0 %vm199_vm0, %v456_v10  ;;  %v464_v11 = vpack.c.bf16 %v439_v9, %v438_v8  ;;  %v331_v13 = vld [vmem:[#allocation2 + $0xf8] sm:$0xff] }
  0xa3   : > { %v499_v31 = vpop.permute.xlu0 %498  ;;  %v356_v14 = vpack.c.bf16 %v331_v13, %v330_v12  ;;  %v344_v4 = vld [vmem:[#allocation2 + $0x198] sm:$0xff] }
  0xa4   : > { %v497_v23 = vpop.permute.xlu1 %496  ;;  %v544_v34 = vsel %vm199_vm0, %v350_v30, %v499_v31  ;;  %v335_v30 = vld [vmem:[#allocation2 + $0x128] sm:$0xff] }
  0xa5   : > { %v540_v26 = vsel %vm199_vm0, %v349_v22, %v497_v23  ;;  %v333_v22 = vld [vmem:[#allocation2 + $0x110] sm:$0xff]  ;;  %v358_v31 = vpack.c.bf16 %v335_v30, %v334_v29  ;;  %v1661_v30 = vld [vmem:[%s4867_s2 + $0x18] sm:$0xff] }
  0xa6   : > { %v357_v23 = vpack.c.bf16 %v333_v22, %v332_v20  ;;  %v1660_v29 = vld [vmem:[%s4867_s2 + $0x10] sm:$0xff] }
  0xa7   : > { %v503_v47 = vpop.permute.xlu0 %502 }
  0xa8   : > { %v501_v39 = vpop.permute.xlu1 %500  ;;  %v552_v50 = vsel %vm199_vm0, %v352_v46, %v503_v47  ;;  %v339_v46 = vld [vmem:[#allocation2 + $0x158] sm:$0xff] }
  0xa9   : > { %845 = vmatmul.mubr.bf16.gmra.mrb[8].mxu0 %v536_v17  ;;  %v548_v42 = vsel %vm199_vm0, %v351_v38, %v501_v39  ;;  %v441_v17 = vld [vmem:[#allocation2 + $0x112] sm:$0xff]  ;;  %v337_v38 = vld [vmem:[#allocation2 + $0x140] sm:$0xff]  ;;  %v360_v47 = vpack.c.bf16 %v339_v46, %v338_v45 }
  0xaa   : > { %3129 = vmatprep.mubr.msk.bf16.mxu0 %vm199_vm0, %v457_v18  ;;  %v465_v19 = vpack.c.bf16 %v441_v17, %v440_v16  ;;  %v359_v39 = vpack.c.bf16 %v337_v38, %v336_v37  ;;  %v3252_v45 = vld [vmem:[%s4867_s2 + $0x40] ss:$8 sps:$4 sm:$0xff]  }
  0xab   : > { %v507_v63 = vpop.permute.xlu0 %506 }
  0xac   : > { %v505_v55 = vpop.permute.xlu1 %504  ;;  %v560_v2 = vsel %vm199_vm0, %v354_v62, %v507_v63  ;;  %v343_v62 = vld [vmem:[#allocation2 + $0x188] sm:$0xff] }
  0xad   : > { %v556_v58 = vsel %vm199_vm0, %v353_v54, %v505_v55  ;;  %v341_v54 = vld [vmem:[#allocation2 + $0x170] sm:$0xff]  ;;  %v362_v63 = vpack.c.bf16 %v343_v62, %v342_v61 }
  0xae   : > { %v361_v55 = vpack.c.bf16 %v341_v54, %v340_v53  ;;  %v3255_v53 = vld [vmem:[%s4867_s2 + $0x64] ss:$8 sps:$4 sm:$0xff]   ;;  %v3258_v61 = vld [vmem:[%s4867_s2 + $0x74] ss:$8 sps:$4 sm:$0xff]  }
  0xaf   : > { %v511_v15 = vpop.permute.xlu0 %510 }
  0xb0   : > { %v509_v7 = vpop.permute.xlu1 %508  ;;  %v568_v18 = vsel %vm199_vm0, %v356_v14, %v511_v15 }
  0xb1   : > { %855 = vmatmul.mubr.bf16.gmra.mrb[12].mxu0 %v540_v26  ;;  %v564_v10 = vsel %vm199_vm0, %v355_v6, %v509_v7  ;;  %v443_v26 = vld [vmem:[#allocation2 + $0x12a] sm:$0xff]  ;;  %v345_v7 = vld [vmem:[#allocation2 + $0x1a0] sm:$0xff] }
  0xb2   : > { %3130 = vmatprep.mubr.msk.bf16.mxu0 %vm199_vm0, %v458_v27  ;;  %v466_v28 = vpack.c.bf16 %v443_v26, %v442_v25  ;;  %v363_v8 = vpack.c.bf16 %v345_v7, %v344_v4  ;;  %v3242_v25 = vld [vmem:[%s4867_s2] ss:$8 sps:$4 sm:$0xff]   ;;  %v3263_v7 = vld [vmem:[%s4867_s2 + $0x94] ss:$8 sps:$4 sm:$0xff]  }
  0xb3   : > { %v515_v32 = vpop.permute.xlu0 %514 }
  0xb4   : > { %v513_v24 = vpop.permute.xlu1 %512 }
  0xb5   : > { %v572_v27 = vsel %vm199_vm0, %v357_v23, %v513_v24  ;;  %v3240_v23 = vld [vmem:[%s4867_s2 + $0x4] ss:$8 sps:$4 sm:$0xff]  }
  0xb6   : > { %1856 = vmatprep.subr.bf16.mxu1 %v3240_v23 }
  0xb7   : > { %v519_v48 = vpop.permute.xlu0 %518  ;;  %1857 = vmatpush1.bf16.msra.mxu1 %v3242_v25  ;;  %v1680_v25 = vld [vmem:[%s4867_s2 + $0xb0] sm:$0xff] }
  0xb8   : > { %v517_v40 = vpop.permute.xlu1 %516 }
  0xb9   : > { %865 = vmatmul.mubr.bf16.gmra.mrb[16].mxu0 %v544_v34  ;;  %v445_v34 = vld [vmem:[#allocation2 + $0x142] sm:$0xff] }
  0xba   : > { %3131 = vmatprep.mubr.msk.bf16.mxu0 %vm199_vm0, %v459_v35  ;;  %v576_v35 = vsel %vm199_vm0, %v358_v31, %v515_v32  ;;  %v467_v36 = vpack.c.bf16 %v445_v34, %v444_v33  ;;  %v3243_v31 = vld [vmem:[%s4867_s2 + $0x14] ss:$8 sps:$4 sm:$0xff]   ;;  %v3149_v32 = vcombine.low %v1660_v29, %v1661_v30  ;;  %v3245_v33 = vld [vmem:[%s4867_s2 + $0x24] ss:$8 sps:$4 sm:$0xff]  }
  0xbb   : > { %v523_v0 = vpop.permute.xlu0 %522  ;;  %1858 = vmatprep.subr.bf16.mxu1 %v3243_v31  ;;  %v1681_v29 = vld [vmem:[%s4867_s2 + $0xb8] sm:$0xff] }
  0xbc   : > { %v521_v56 = vpop.permute.xlu1 %520  ;;  %v592_v1 = vsel %vm199_vm0, %v362_v63, %v523_v0  ;;  %1859 = vmatpush1.bf16.msra.mxu1 %v3149_v32  ;;  %v3260_v63 = vld [vmem:[%s4867_s2 + $0x84] ss:$8 sps:$4 sm:$0xff]   ;;  %v3268_v30 = vld [vmem:[%s4867_s2 + $0xb4] ss:$8 sps:$4 sm:$0xff]   ;;  %v3169_v31 = vcombine.low %v1680_v25, %v1681_v29 }
  0xbd   : > { %1860 = vmatprep.subr.bf16.mxu1 %v3245_v33  ;;  %v1478_v32 = vld [vmem:[#allocation2 + $0x2] sm:$0xff]  ;;  %v1479_v33 = vld [vmem:[#allocation2 + $0xa] sm:$0xff] }
  0xc0   : > { %v525_v5 = vpop.permute.xlu1 %524 }
  0xc1   : > { %875 = vmatmul.mubr.bf16.gmra.mrb[20].mxu0 %v548_v42  ;;  %v447_v42 = vld [vmem:[#allocation2 + $0x15a] sm:$0xff]  ;;  %v596_v9 = vsel %vm199_vm0, %v363_v8, %v525_v5  ;;  %v1676_v5 = vld [vmem:[%s4867_s2 + $0x90] sm:$0xff] }
  0xc2   : > { %3132 = vmatprep.mubr.msk.bf16.mxu0 %vm199_vm0, %v460_v43  ;;  %v580_v43 = vsel %vm199_vm0, %v359_v39, %v517_v40  ;;  %v468_v44 = vpack.c.bf16 %v447_v42, %v446_v41  ;;  %v1664_v39 = vld [vmem:[%s4867_s2 + $0x30] sm:$0xff]  ;;  %v1665_v40 = vld [vmem:[%s4867_s2 + $0x38] sm:$0xff] }
  0xc3   : > { %v3248_v41 = vld [vmem:[%s4867_s2 + $0x34] ss:$8 sps:$4 sm:$0xff]   ;;  %v3153_v42 = vcombine.low %v1664_v39, %v1665_v40 }
  0xc9   : > { %885 = vmatmul.mubr.bf16.gmra.mrb[24].mxu0 %v552_v50  ;;  %v449_v50 = vld [vmem:[#allocation2 + $0x172] sm:$0xff] }
  0xca   : > { %3133 = vmatprep.mubr.msk.bf16.mxu0 %vm199_vm0, %v461_v51  ;;  %v584_v51 = vsel %vm199_vm0, %v360_v47, %v519_v48  ;;  %v469_v52 = vpack.c.bf16 %v449_v50, %v448_v49  ;;  %v1668_v49 = vld [vmem:[%s4867_s2 + $0x50] sm:$0xff]  ;;  %v1669_v50 = vld [vmem:[%s4867_s2 + $0x58] sm:$0xff] }
  0xd1   : > { %895 = vmatmul.mubr.bf16.gmra.mrb[28].mxu0 %v556_v58  ;;  %v451_v58 = vld [vmem:[#allocation2 + $0x18a] sm:$0xff] }
  0xd2   : > { %3134 = vmatprep.mubr.msk.bf16.mxu0 %vm199_vm0, %v462_v59  ;;  %v588_v59 = vsel %vm199_vm0, %v361_v55, %v521_v56  ;;  %v470_v60 = vpack.c.bf16 %v451_v58, %v450_v57  ;;  %v3257_v55 = vld [vmem:[%s4867_s2 + $0x60] ss:$8 sps:$4 sm:$0xff]  }
  0xd9   : > { %905 = vmatmul.mubr.bf16.gmra.mrb[32].mxu0 %v560_v2  ;;  %v452_v2 = vld [vmem:[#allocation2 + $0x19a] sm:$0xff] }
  0xda   : > { %3135 = vmatprep.mubr.msk.bf16.mxu0 %vm199_vm0, %v463_v3  ;;  %v453_v3 = vld [vmem:[#allocation2 + $0x1a2] sm:$0xff] }
  0xdb   : > { %v471_v6 = vpack.c.bf16 %v453_v3, %v452_v2 }
  0xe1   : > { %915 = vmatmul.mubr.bf16.gmra.mrb[36].mxu0 %v564_v10 }
  0xe2   : > { %3136 = vmatprep.mubr.msk.bf16.mxu0 %vm199_vm0, %v464_v11 }
  0xe9   : > { %925 = vmatmul.mubr.bf16.gmra.mrb[40].mxu0 %v568_v18 }
  0xea   : > { %3137 = vmatprep.mubr.msk.bf16.mxu0 %vm199_vm0, %v465_v19 }
  0xf1   : > { %935 = vmatmul.mubr.bf16.gmra.mrb[44].mxu0 %v572_v27 }
  0xf2   : > { %3138 = vmatprep.mubr.msk.bf16.mxu0 %vm199_vm0, %v466_v28 }
  0xf9   : > { %945 = vmatmul.mubr.bf16.gmra.mrb[48].mxu0 %v576_v35  ;;  %v3247_v35 = vld [vmem:[%s4867_s2 + $0x20] ss:$8 sps:$4 sm:$0xff]  }
  0xfa   : > { %3139 = vmatprep.mubr.msk.bf16.mxu0 %vm199_vm0, %v467_v36  ;;  %1861 = vmatpush1.bf16.msra.mxu1 %v3247_v35  ;;  %v1514_v35 = vpack.c.bf16 %v1479_v33, %v1478_v32  ;;  %v3837_v33 = vld [vmem:[%s4868_s3] ss:$0 sm:$0xff] }
  0xfb   : > { %1862 = vmatprep.subr.bf16.mxu1 %v3248_v41 }
  0xfc   : > { %3171 = vmatprep.mubr.msk.bf16.mxu1 %vm199_vm0, %v1514_v35 }
  0xfe   : > { %1863 = vmatpush1.bf16.msra.mxu1 %v3153_v42 }
 0x101   : > { %955 = vmatmul.mubr.bf16.gmra.mrb[52].mxu0 %v580_v43  ;;  %v3250_v43 = vld [vmem:[%s4867_s2 + $0x44] ss:$8 sps:$4 sm:$0xff]  }
 0x102   : > { %3140 = vmatprep.mubr.msk.bf16.mxu0 %vm199_vm0, %v468_v44  ;;  %1864 = vmatprep.subr.bf16.mxu1 %v3250_v43 }
 0x103   : > { %1865 = vmatpush1.bf16.msra.mxu1 %v3252_v45 }
 0x109   : > { %965 = vmatmul.mubr.bf16.gmra.mrb[56].mxu0 %v584_v51  ;;  %v3253_v51 = vld [vmem:[%s4867_s2 + $0x54] ss:$8 sps:$4 sm:$0xff]  }
 0x10a   : > { %3141 = vmatprep.mubr.msk.bf16.mxu0 %vm199_vm0, %v469_v52  ;;  %v3157_v52 = vcombine.low %v1668_v49, %v1669_v50  ;;  %1866 = vmatprep.subr.bf16.mxu1 %v3253_v51 }
 0x10c   : > { %1867 = vmatpush1.bf16.msra.mxu1 %v3157_v52 }
 0x10d   : > { %1868 = vmatprep.subr.bf16.mxu1 %v3255_v53 }
 0x110   : > { %1869 = vmatpush1.bf16.msra.mxu1 %v3257_v55 }
 0x111   : > { %975 = vmatmul.mubr.bf16.gmra.mrb[60].mxu0 %v588_v59  ;;  %v1672_v59 = vld [vmem:[%s4867_s2 + $0x70] sm:$0xff]  ;;  %1870 = vmatprep.subr.bf16.mxu1 %v3258_v61 }
 0x112   : > { %3142 = vmatprep.mubr.msk.bf16.mxu0 %vm199_vm0, %v470_v60  ;;  %v1673_v60 = vld [vmem:[%s4867_s2 + $0x78] sm:$0xff] }
 0x113   : > { %v3161_v62 = vcombine.low %v1672_v59, %v1673_v60 }
 0x115   : > { %1871 = vmatpush1.bf16.msra.mxu1 %v3161_v62 }
 0x116   : > { %1872 = vmatprep.subr.bf16.mxu1 %v3260_v63 }
 0x119   : > { %985 = vmatmul.mubr.bf16.gmra.mrb[64].mxu0 %v592_v1  ;;  %v3262_v1 = vld [vmem:[%s4867_s2 + $0x80] ss:$8 sps:$4 sm:$0xff]  }
 0x11a   : > { %3143 = vmatprep.mubr.msk.bf16.mxu0 %vm199_vm0, %v471_v6  ;;  %1873 = vmatpush1.bf16.msra.mxu1 %v3262_v1  ;;  %v1677_v6 = vld [vmem:[%s4867_s2 + $0x98] sm:$0xff] }
 0x11b   : > { %v3165_v8 = vcombine.low %v1676_v5, %v1677_v6  ;;  %1874 = vmatprep.subr.bf16.mxu1 %v3263_v7 }
 0x11e   : > { %1875 = vmatpush1.bf16.msra.mxu1 %v3165_v8 }
 0x121   : > { %995 = vmatmul.mubr.bf16.gmra.mrb[68].mxu0 %v596_v9  ;;  %v3265_v9 = vld [vmem:[%s4867_s2 + $0xa4] ss:$8 sps:$4 sm:$0xff]  }
 0x122   : > { %1876 = vmatprep.subr.bf16.mxu1 %v3265_v9 }
 0x162   : > { %v3574_v10 = vpop.f32.mrb[0].mxu0 }
 0x163   : > { %v832_v11 = vpop.f32.mrb[1].mxu0 }
 0x164   : > { %v3576_v12 = vpop.f32.mrb[2].mxu0 }
 0x165   : > { %v835_v13 = vpop.f32.mrb[3].mxu0 }
 0x166   : > { %v3267_v13 = vld [vmem:[%s4867_s2 + $0xa0] ss:$8 sps:$4 sm:$0xff]  }
 0x167   : > { %1877 = vmatpush1.bf16.msra.mxu1 %v3267_v13 }
 0x168   : > { %1878 = vmatprep.subr.bf16.mxu1 %v3268_v30 }
 0x16b   : > { %1879 = vmatpush1.bf16.msra.mxu1 %v3169_v31 }
 0x174   : > { %v3578_v14 = vpop.f32.mrb[4].mxu0 }
 0x175   : > { %1035 = vrot.lane.b32.xlu0 %v3578_v14, %s3279_s17  ;;  %v840_v15 = vpop.f32.mrb[5].mxu0 }
 0x176   : > { %v3582_v16 = vpop.f32.mrb[6].mxu0 }
 0x177   : > { %1037 = vrot.lane.b32.xlu1 %v3582_v16, %s3279_s17  ;;  %v843_v17 = vpop.f32.mrb[7].mxu0 }
 0x17c   : > { %v3586_v18 = vpop.f32.mrb[8].mxu0 }
 0x17d   : > { %1039 = vrot.lane.b32.xlu0 %v3586_v18, %s3279_s17  ;;  %v3590_v19 = vpop.f32.mrb[9].mxu0 }
 0x17e   : > { %v3592_v20 = vpop.f32.mrb[10].mxu0 }
 0x17f   : > { %1041 = vrot.lane.b32.xlu1 %v3592_v20, %s3279_s17  ;;  %v3596_v22 = vpop.f32.mrb[11].mxu0 }
 0x184   : > { %v3601_v24 = vpop.f32.mrb[12].mxu0 }
 0x185   : > { %1043 = vrot.lane.b32.xlu0 %v3601_v24, %s3279_s17  ;;  %v3608_v26 = vpop.f32.mrb[13].mxu0 }
 0x186   : > { %v3610_v27 = vpop.f32.mrb[14].mxu0 }
 0x187   : > { %1045 = vrot.lane.b32.xlu1 %v3610_v27, %s3279_s17  ;;  %v3614_v28 = vpop.f32.mrb[15].mxu0 }
 0x18c   : > { %v3628_v34 = vpop.f32.mrb[16].mxu0 }
 0x18d   : > { %1047 = vrot.lane.b32.xlu0 %v3628_v34, %s3279_s17  ;;  %v3635_v36 = vpop.f32.mrb[17].mxu0 }
 0x18e   : > { %v3637_v37 = vpop.f32.mrb[18].mxu0 }
 0x18f   : > { %1049 = vrot.lane.b32.xlu1 %v3637_v37, %s3279_s17  ;;  %v3641_v38 = vpop.f32.mrb[19].mxu0 }
 0x194   : > { %v3655_v44 = vpop.f32.mrb[20].mxu0 }
 0x195   : > { %1051 = vrot.lane.b32.xlu0 %v3655_v44, %s3279_s17  ;;  %v3662_v46 = vpop.f32.mrb[21].mxu0 }
 0x196   : > { %v3664_v47 = vpop.f32.mrb[22].mxu0 }
 0x197   : > { %1053 = vrot.lane.b32.xlu1 %v3664_v47, %s3279_s17  ;;  %v3668_v48 = vpop.f32.mrb[23].mxu0 }
 0x19c   : > { %v3682_v54 = vpop.f32.mrb[24].mxu0 }
 0x19d   : > { %1055 = vrot.lane.b32.xlu0 %v3682_v54, %s3279_s17  ;;  %v3689_v56 = vpop.f32.mrb[25].mxu0 }
 0x19e   : > { %v3691_v57 = vpop.f32.mrb[26].mxu0 }
 0x19f   : > { %1057 = vrot.lane.b32.xlu1 %v3691_v57, %s3279_s17  ;;  %v3695_v58 = vpop.f32.mrb[27].mxu0 }
 0x1a4   : > { %v3709_v0 = vpop.f32.mrb[28].mxu0 }
 0x1a5   : > { %1059 = vrot.lane.b32.xlu0 %v3709_v0, %s3279_s17  ;;  %v3716_v2 = vpop.f32.mrb[29].mxu0 }
 0x1a6   : > { %v3718_v3 = vpop.f32.mrb[30].mxu0 }
 0x1a7   : > { %1061 = vrot.lane.b32.xlu1 %v3718_v3, %s3279_s17  ;;  %v3722_v4 = vpop.f32.mrb[31].mxu0 }
 0x1ac   : > { %v3736_v11 = vpop.f32.mrb[32].mxu0 }
 0x1ad   : > { %1063 = vrot.lane.b32.xlu0 %v3736_v11, %s3279_s17  ;;  %v3743_v15 = vpop.f32.mrb[33].mxu0 }
 0x1ae   : > { %v3745_v17 = vpop.f32.mrb[34].mxu0 }
 0x1af   : > { %1065 = vrot.lane.b32.xlu1 %v3745_v17, %s3279_s17  ;;  %v3749_v23 = vpop.f32.mrb[35].mxu0 }
 0x1b4   : > { %v3760_v39 = vpop.f32.mrb[36].mxu0 }
 0x1b5   : > { %1067 = vrot.lane.b32.xlu0 %v3760_v39, %s3279_s17  ;;  %v3765_v40 = vpop.f32.mrb[37].mxu0 }
 0x1b6   : > { %v3767_v41 = vpop.f32.mrb[38].mxu0 }
 0x1b7   : > { %1069 = vrot.lane.b32.xlu1 %v3767_v41, %s3279_s17  ;;  %v3771_v42 = vpop.f32.mrb[39].mxu0 }
 0x1bc   : > { %v3773_v43 = vpop.f32.mrb[40].mxu0 }
 0x1bd   : > { %1071 = vrot.lane.b32.xlu0 %v3773_v43, %s3279_s17  ;;  %v3777_v45 = vpop.f32.mrb[41].mxu0 }
 0x1be   : > { %v3779_v49 = vpop.f32.mrb[42].mxu0 }
 0x1bf   : > { %1073 = vrot.lane.b32.xlu1 %v3779_v49, %s3279_s17  ;;  %v3783_v50 = vpop.f32.mrb[43].mxu0 }
 0x1c1   : > { %1550 = vrot.lane.b32.xlu0 %v3412_v21, %s3279_s17 }
 0x1c4   : > { %v3787_v51 = vpop.f32.mrb[44].mxu0 }
 0x1c5   : > { %4875 = vst [vmem:[#allocation3_spill] sm:$0xff] %v3787_v51  ;;  %1075 = vrot.lane.b32.xlu1 %v3787_v51, %s3279_s17  ;;  %v3791_v52 = vpop.f32.mrb[45].mxu0 }
 0x1c6   : > { %v3793_v53 = vpop.f32.mrb[46].mxu0 }
 0x1c7   : > { %4876 = vst [vmem:[#allocation4_spill] sm:$0xff] %v3793_v53  ;;  %1077 = vrot.lane.b32.xlu0 %v3793_v53, %s3279_s17  ;;  %v3797_v55 = vpop.f32.mrb[47].mxu0 }
 0x1cc   : > { %v3799_v59 = vpop.f32.mrb[48].mxu0 }
 0x1cd   : > { %4877 = vst [vmem:[#allocation5_spill] sm:$0xff] %v3799_v59  ;;  %1079 = vrot.lane.b32.xlu0 %v3799_v59, %s3279_s17  ;;  %v3803_v21 = vpop.f32.mrb[49].mxu0 }
 0x1ce   : > { %v3805_v60 = vpop.f32.mrb[50].mxu0 }
 0x1cf   : > { %v3807_v61 = vpop.f32.mrb[51].mxu0 }
 0x1d0   : > { %4878 = vst [vmem:[#allocation6_spill] sm:$0xff] %v3807_v61 }
 0x1d4   : > { %v3809_v62 = vpop.f32.mrb[52].mxu0 }
 0x1d5   : > { %v3811_v63 = vpop.f32.mrb[53].mxu0 }
 0x1d6   : > { %4879 = vst [vmem:[#allocation7_spill] sm:$0xff] %v3811_v63  ;;  %v3813_v1 = vpop.f32.mrb[54].mxu0 }
 0x1d7   : > { %v3815_v5 = vpop.f32.mrb[55].mxu0 }
 0x1d8   : > { %4880 = vst [vmem:[#allocation8_spill] sm:$0xff] %v3815_v5 }
 0x1dc   : > { %v3817_v6 = vpop.f32.mrb[56].mxu0 }
 0x1dd   : > { %v3819_v7 = vpop.f32.mrb[57].mxu0 }
 0x1de   : > { %4881 = vst [vmem:[#allocation9_spill] sm:$0xff] %v3819_v7  ;;  %v3821_v8 = vpop.f32.mrb[58].mxu0 }
 0x1df   : > { %v3823_v9 = vpop.f32.mrb[59].mxu0 }
 0x1e0   : > { %4882 = vst [vmem:[#allocation10_spill] sm:$0xff] %v3823_v9 }
 0x1e4   : > { %v3825_v13 = vpop.f32.mrb[60].mxu0 }
 0x1e5   : > { %v3827_v25 = vpop.f32.mrb[61].mxu0 }
 0x1e6   : > { %4883 = vst [vmem:[#allocation11_spill] sm:$0xff] %v3827_v25  ;;  %v3829_v29 = vpop.f32.mrb[62].mxu0 }
 0x1e7   : > { %v1036_v30 = vpop.permute.xlu0 %1035  ;;  %v3831_v31 = vpop.f32.mrb[63].mxu0 }
 0x1e8   : > { %4884 = vst [vmem:[#allocation12_spill] sm:$0xff] %v3831_v31  ;;  %v1131_v32 = vadd.f32 %v1036_v30, %v3574_v10  ;;  %v3848_v10 = vld [vmem:[%s4868_s3 + $0x1] ss:$0 sm:$0xff] }
 0x1e9   : > { %v1038_v35 = vpop.permute.xlu1 %1037 }
 0x1ea   : > { %v1163_v7 = vadd.f32 %v1131_v32, %v3590_v19  ;;  %v1132_v9 = vadd.f32 %v1038_v35, %v3576_v12  ;;  %v3858_v12 = vld [vmem:[%s4868_s3 + $0x2] ss:$0 sm:$0xff] }
 0x1ec   : > { %v1202_v59 = vadd.f32 %v3837_v33, %v1163_v7  ;;  %v1164_v25 = vadd.f32 %v1132_v9, %v3596_v22  ;;  %v3843_v5 = vpop.f32.mrb[64].mxu0 }
 0x1ed   : > { %v3850_v30 = vpop.f32.mrb[65].mxu0 }
 0x1ee   : > { %4885 = vst [vmem:[#allocation13_spill] sm:$0xff] %v3850_v30  ;;  %v1234_v31 = vmax.f32 %v1202_v59, 0.0  ;;  %v1203_v53 = vadd.f32 %v3837_v33, %v1164_v25  ;;  %v3853_v63 = vpop.f32.mrb[66].mxu0 }
 0x1ef   : > { %v1040_v19 = vpop.permute.xlu0 %1039  ;;  %v3860_v22 = vpop.f32.mrb[67].mxu0 }
 0x1f0   : > { %4886 = vst [vmem:[#allocation14_spill] sm:$0xff] %v3860_v22  ;;  %v1270_v7 = vmul.f32 %v3848_v10, %v1234_v31  ;;  %v1235_v9 = vmax.f32 %v1203_v53, 0.0  ;;  %v1133_v32 = vadd.f32 %v1040_v19, %v3578_v14 }
 0x1f1   : > { %v1042_v35 = vpop.permute.xlu1 %1041 }
 0x1f2   : > { %v1306_v59 = vadd.f32 %v3858_v12, %v1270_v7  ;;  %v1271_v25 = vmul.f32 %v3848_v10, %v1235_v9  ;;  %v1165_v30 = vadd.f32 %v1133_v32, %v3608_v26  ;;  %v1134_v51 = vadd.f32 %v1042_v35, %v3582_v16 }
 0x1f4   : > { %1338 = vst.msk [vmem:[#allocation2 + $0x19] sm:$0xff] %vm199_vm0, %v1306_v59  ;;  %v1307_v61 = vadd.f32 %v3858_v12, %v1271_v25  ;;  %v1204_v22 = vadd.f32 %v3837_v33, %v1165_v30  ;;  %v1166_v31 = vadd.f32 %v1134_v51, %v3614_v28 }
 0x1f6   : > { %1339 = vst.msk [vmem:[#allocation2 + $0x21] sm:$0xff] %vm199_vm0, %v1307_v61  ;;  %v1236_v14 = vmax.f32 %v1204_v22, 0.0  ;;  %v1205_v53 = vadd.f32 %v3837_v33, %v1166_v31 }
 0x1f7   : > { %v1044_v19 = vpop.permute.xlu0 %1043 }
 0x1f8   : > { %v1272_v7 = vmul.f32 %v3848_v10, %v1236_v14  ;;  %v1237_v9 = vmax.f32 %v1205_v53, 0.0  ;;  %v1135_v26 = vadd.f32 %v1044_v19, %v3586_v18 }
 0x1f9   : > { %v1046_v16 = vpop.permute.xlu1 %1045 }
 0x1fa   : > { %v1308_v32 = vadd.f32 %v3858_v12, %v1272_v7  ;;  %v1273_v35 = vmul.f32 %v3848_v10, %v1237_v9  ;;  %v1167_v30 = vadd.f32 %v1135_v26, %v3635_v36  ;;  %v1136_v28 = vadd.f32 %v1046_v16, %v3592_v20 }
 0x1fb   : > { %v1426_v59 = vld [vmem:[#allocation2 + $0x19] sm:$0xff] }
 0x1fc   : > { %1340 = vst.msk [vmem:[#allocation2 + $0x31] sm:$0xff] %vm199_vm0, %v1308_v32  ;;  %v1309_v51 = vadd.f32 %v3858_v12, %v1273_v35  ;;  %v1206_v61 = vadd.f32 %v3837_v33, %v1167_v30  ;;  %v1168_v22 = vadd.f32 %v1136_v28, %v3641_v38 }
 0x1fd   : > { %v1427_v25 = vld [vmem:[#allocation2 + $0x21] sm:$0xff] }
 0x1fe   : > { %1341 = vst.msk [vmem:[#allocation2 + $0x39] sm:$0xff] %vm199_vm0, %v1309_v51  ;;  %v1238_v18 = vmax.f32 %v1206_v61, 0.0  ;;  %v1207_v31 = vadd.f32 %v3837_v33, %v1168_v22  ;;  %v1461_v14 = vpack.c.bf16 %v1427_v25, %v1426_v59 }
 0x1ff   : > { %v1048_v53 = vpop.permute.xlu0 %1047 }
 0x200   : > { %v1274_v36 = vmul.f32 %v3848_v10, %v1238_v18  ;;  %v1239_v20 = vmax.f32 %v1207_v31, 0.0  ;;  %v1137_v19 = vadd.f32 %v1048_v53, %v3601_v24  ;;  %1552 = vrot.lane.b32.xlu1 %v1461_v14, %s3279_s17 }
 0x201   : > { %v1050_v7 = vpop.permute.xlu1 %1049 }
 0x202   : > { %v1310_v9 = vadd.f32 %v3858_v12, %v1274_v36  ;;  %v1275_v38 = vmul.f32 %v3848_v10, %v1239_v20  ;;  %v1169_v26 = vadd.f32 %v1137_v19, %v3662_v46  ;;  %v1138_v16 = vadd.f32 %v1050_v7, %v3610_v27 }
 0x203   : > { %v1428_v24 = vld [vmem:[#allocation2 + $0x31] sm:$0xff] }
 0x204   : > { %1342 = vst.msk [vmem:[#allocation2 + $0x49] sm:$0xff] %vm199_vm0, %v1310_v9  ;;  %v1311_v32 = vadd.f32 %v3858_v12, %v1275_v38  ;;  %v1208_v35 = vadd.f32 %v3837_v33, %v1169_v26  ;;  %v1170_v30 = vadd.f32 %v1138_v16, %v3668_v48  ;;  %1081 = vrot.lane.b32.xlu1 %v3805_v60, %s3279_s17 }
 0x205   : > { %v1429_v28 = vld [vmem:[#allocation2 + $0x39] sm:$0xff] }
 0x206   : > { %1343 = vst.msk [vmem:[#allocation2 + $0x51] sm:$0xff] %vm199_vm0, %v1311_v32  ;;  %v1240_v51 = vmax.f32 %v1208_v35, 0.0  ;;  %v1209_v46 = vadd.f32 %v3837_v33, %v1170_v30  ;;  %v1462_v61 = vpack.c.bf16 %v1429_v28, %v1428_v24 }
 0x207   : > { %v1052_v27 = vpop.permute.xlu0 %1051 }
 0x208   : > { %v1276_v22 = vmul.f32 %v3848_v10, %v1240_v51  ;;  %v1241_v59 = vmax.f32 %v1209_v46, 0.0  ;;  %v1139_v25 = vadd.f32 %v1052_v27, %v3628_v34  ;;  %1554 = vrot.lane.b32.xlu0 %v1462_v61, %s3279_s17  ;;  %1083 = vrot.lane.b32.xlu1 %v3809_v62, %s3279_s17  ;;  %v996_v51 = vpop.f32.mrb[68].mxu0 }
 0x209   : > { %v1054_v48 = vpop.permute.xlu1 %1053  ;;  %v3933_v27 = vpop.f32.mrb[69].mxu0 }
 0x20a   : > { %v1312_v18 = vadd.f32 %v3858_v12, %v1276_v22  ;;  %v1277_v31 = vmul.f32 %v3848_v10, %v1241_v59  ;;  %v1171_v14 = vadd.f32 %v1139_v25, %v3689_v56  ;;  %v1140_v53 = vadd.f32 %v1054_v48, %v3637_v37  ;;  %v999_v25 = vpop.f32.mrb[70].mxu0 }
 0x20b   : > { %v1430_v19 = vld [vmem:[#allocation2 + $0x49] sm:$0xff] }
 0x20c   : > { %1344 = vst.msk [vmem:[#allocation2 + $0x61] sm:$0xff] %vm199_vm0, %v1312_v18  ;;  %v1313_v36 = vadd.f32 %v3858_v12, %v1277_v31  ;;  %v1210_v34 = vadd.f32 %v3837_v33, %v1171_v14  ;;  %v1172_v20 = vadd.f32 %v1140_v53, %v3695_v58  ;;  %1085 = vrot.lane.b32.xlu0 %v3813_v1, %s3279_s17  ;;  %v3937_v18 = vpop.f32.mrb[71].mxu0 }
 0x20d   : > { %v1431_v7 = vld [vmem:[#allocation2 + $0x51] sm:$0xff] }
 0x20e   : > { %1345 = vst.msk [vmem:[#allocation2 + $0x69] sm:$0xff] %vm199_vm0, %v1313_v36  ;;  %v1242_v9 = vmax.f32 %v1210_v34, 0.0  ;;  %v1211_v56 = vadd.f32 %v3837_v33, %v1172_v20  ;;  %v1463_v38 = vpack.c.bf16 %v1431_v7, %v1430_v19 }
 0x20f   : > { %v1056_v37 = vpop.permute.xlu0 %1055 }
 0x210   : > { %v1278_v26 = vmul.f32 %v3848_v10, %v1242_v9  ;;  %v1243_v16 = vmax.f32 %v1211_v56, 0.0  ;;  %v1141_v32 = vadd.f32 %v1056_v37, %v3655_v44  ;;  %1556 = vrot.lane.b32.xlu1 %v1463_v38, %s3279_s17  ;;  %1087 = vrot.lane.b32.xlu0 %v3817_v6, %s3279_s17 }
 0x211   : > { %v1058_v58 = vpop.permute.xlu1 %1057 }
 0x212   : > { %v1314_v35 = vadd.f32 %v3858_v12, %v1278_v26  ;;  %v1279_v30 = vmul.f32 %v3848_v10, %v1243_v16  ;;  %v1173_v24 = vadd.f32 %v1141_v32, %v3716_v2  ;;  %v1142_v28 = vadd.f32 %v1058_v58, %v3664_v47 }
 0x213   : > { %v1432_v22 = vld [vmem:[#allocation2 + $0x61] sm:$0xff] }
 0x214   : > { %1346 = vst.msk [vmem:[#allocation2 + $0x79] sm:$0xff] %vm199_vm0, %v1314_v35  ;;  %v1315_v46 = vadd.f32 %v3858_v12, %v1279_v30  ;;  %v1212_v44 = vadd.f32 %v3837_v33, %v1173_v24  ;;  %v1174_v61 = vadd.f32 %v1142_v28, %v3722_v4  ;;  %1089 = vrot.lane.b32.xlu1 %v3821_v8, %s3279_s17 }
 0x215   : > { %v1433_v59 = vld [vmem:[#allocation2 + $0x69] sm:$0xff] }
 0x216   : > { %1347 = vst.msk [vmem:[#allocation2 + $0x81] sm:$0xff] %vm199_vm0, %v1315_v46  ;;  %v1244_v47 = vmax.f32 %v1212_v44, 0.0  ;;  %v1213_v2 = vadd.f32 %v3837_v33, %v1174_v61  ;;  %v1464_v48 = vpack.c.bf16 %v1433_v59, %v1432_v22 }
 0x217   : > { %v1060_v31 = vpop.permute.xlu0 %1059 }
 0x218   : > { %v1280_v14 = vmul.f32 %v3848_v10, %v1244_v47  ;;  %v1245_v4 = vmax.f32 %v1213_v2, 0.0  ;;  %v1143_v53 = vadd.f32 %v1060_v31, %v3682_v54  ;;  %1558 = vrot.lane.b32.xlu0 %v1464_v48, %s3279_s17  ;;  %1091 = vrot.lane.b32.xlu1 %v3825_v13, %s3279_s17 }
 0x219   : > { %v1062_v36 = vpop.permute.xlu1 %1061 }
 0x21a   : > { %v1316_v34 = vadd.f32 %v3858_v12, %v1280_v14  ;;  %v1281_v20 = vmul.f32 %v3848_v10, %v1245_v4  ;;  %v1175_v19 = vadd.f32 %v1143_v53, %v3743_v15  ;;  %v1144_v7 = vadd.f32 %v1062_v36, %v3691_v57 }
 0x21b   : > { %v1434_v38 = vld [vmem:[#allocation2 + $0x79] sm:$0xff] }
 0x21c   : > { %1348 = vst.msk [vmem:[#allocation2 + $0x91] sm:$0xff] %vm199_vm0, %v1316_v34  ;;  %v1317_v9 = vadd.f32 %v3858_v12, %v1281_v20  ;;  %v1214_v54 = vadd.f32 %v3837_v33, %v1175_v19  ;;  %v1176_v56 = vadd.f32 %v1144_v7, %v3749_v23  ;;  %1093 = vrot.lane.b32.xlu0 %v3829_v29, %s3279_s17  ;;  %v1371_v19 = vld [vmem:[#allocation2 + $0x8] sm:$0xff] }
 0x21d   : > { %v1435_v37 = vld [vmem:[#allocation2 + $0x81] sm:$0xff] }
 0x21e   : > { %1349 = vst.msk [vmem:[#allocation2 + $0x99] sm:$0xff] %vm199_vm0, %v1317_v9  ;;  %v1246_v26 = vmax.f32 %v1214_v54, 0.0  ;;  %v1215_v15 = vadd.f32 %v3837_v33, %v1176_v56  ;;  %v1465_v16 = vpack.c.bf16 %v1435_v37, %v1434_v38 }
 0x21f   : > { %v1064_v57 = vpop.permute.xlu0 %1063 }
 0x220   : > { %v1282_v32 = vmul.f32 %v3848_v10, %v1246_v26  ;;  %v1247_v58 = vmax.f32 %v1215_v15, 0.0  ;;  %v1145_v35 = vadd.f32 %v1064_v57, %v3709_v0  ;;  %1560 = vrot.lane.b32.xlu1 %v1465_v16, %s3279_s17  ;;  %1095 = vrot.lane.b32.xlu0 %v3843_v5, %s3279_s17  ;;  %v1481_v26 = vld [vmem:[#allocation2 + $0x22] sm:$0xff] }
 0x221   : > { %v1066_v23 = vpop.permute.xlu1 %1065 }
 0x222   : > { %v1318_v30 = vadd.f32 %v3858_v12, %v1282_v32  ;;  %v1283_v24 = vmul.f32 %v3848_v10, %v1247_v58  ;;  %v1177_v28 = vadd.f32 %v1145_v35, %v3765_v40  ;;  %v1146_v51 = vadd.f32 %v1066_v23, %v3718_v3 }
 0x223   : > { %v1436_v5 = vld [vmem:[#allocation2 + $0x91] sm:$0xff] }
 0x224   : > { %1350 = vst.msk [vmem:[#allocation2 + $0xa9] sm:$0xff] %vm199_vm0, %v1318_v30  ;;  %v1319_v46 = vadd.f32 %v3858_v12, %v1283_v24  ;;  %v1216_v0 = vadd.f32 %v3837_v33, %v1177_v28  ;;  %v1178_v44 = vadd.f32 %v1146_v51, %v3771_v42  ;;  %1097 = vrot.lane.b32.xlu1 %v3853_v63, %s3279_s17 }
 0x225   : > { %v1437_v61 = vld [vmem:[#allocation2 + $0x99] sm:$0xff] }
 0x226   : > { %1351 = vst.msk [vmem:[#allocation2 + $0xb1] sm:$0xff] %vm199_vm0, %v1319_v46  ;;  %v1248_v22 = vmax.f32 %v1216_v0, 0.0  ;;  %v1217_v40 = vadd.f32 %v3837_v33, %v1178_v44  ;;  %v1466_v59 = vpack.c.bf16 %v1437_v61, %v1436_v5 }
 0x227   : > { %v1068_v3 = vpop.permute.xlu0 %1067 }
 0x228   : > { %v1284_v25 = vmul.f32 %v3848_v10, %v1248_v22  ;;  %v1249_v47 = vmax.f32 %v1217_v40, 0.0  ;;  %v1147_v2 = vadd.f32 %v1068_v3, %v3736_v11  ;;  %1562 = vrot.lane.b32.xlu0 %v1466_v59, %s3279_s17  ;;  %v1370_v11 = vld [vmem:[#allocation2] sm:$0xff] }
 0x229   : > { %v1070_v42 = vpop.permute.xlu1 %1069  ;;  %v1406_v37 = vpack.c.bf16 %v1371_v19, %v1370_v11  ;;  %v4889_v19 = vld [vmem:[#allocation7_spill] sm:$0xff] }
 0x22a   : > { %v1320_v48 = vadd.f32 %v3858_v12, %v1284_v25  ;;  %v1285_v63 = vmul.f32 %v3848_v10, %v1249_v47  ;;  %v1179_v31 = vadd.f32 %v1147_v2, %v3777_v45  ;;  %v1148_v14 = vadd.f32 %v1070_v42, %v3745_v17  ;;  %v4887_v42 = vld [vmem:[#allocation6_spill] sm:$0xff] }
 0x22b   : > { %v1438_v34 = vld [vmem:[#allocation2 + $0xa9] sm:$0xff] }
 0x22c   : > { %1352 = vst.msk [vmem:[#allocation2 + $0xc1] sm:$0xff] %vm199_vm0, %v1320_v48  ;;  %v1321_v4 = vadd.f32 %v3858_v12, %v1285_v63  ;;  %v1218_v53 = vadd.f32 %v3837_v33, %v1179_v31  ;;  %v1180_v36 = vadd.f32 %v1148_v14, %v3783_v50  ;;  %v1480_v50 = vld [vmem:[#allocation2 + $0x1a] sm:$0xff] }
 0x22d   : > { %v1439_v20 = vld [vmem:[#allocation2 + $0xb1] sm:$0xff]  ;;  %v1515_v23 = vpack.c.bf16 %v1481_v26, %v1480_v50 }
 0x22e   : > { %1353 = vst.msk [vmem:[#allocation2 + $0xc9] sm:$0xff] %vm199_vm0, %v1321_v4  ;;  %v1250_v7 = vmax.f32 %v1218_v53, 0.0  ;;  %v1219_v9 = vadd.f32 %v3837_v33, %v1180_v36  ;;  %v1467_v45 = vpack.c.bf16 %v1439_v20, %v1438_v34  ;;  %v4888_v36 = vld [vmem:[#allocation3_spill] sm:$0xff] }
 0x22f   : > { %v1072_v54 = vpop.permute.xlu0 %1071 }
 0x230   : > { %v1286_v17 = vmul.f32 %v3848_v10, %v1250_v7  ;;  %v1251_v56 = vmax.f32 %v1219_v9, 0.0  ;;  %v1149_v38 = vadd.f32 %v1072_v54, %v3760_v39  ;;  %1564 = vrot.lane.b32.xlu1 %v1467_v45, %s3279_s17 }
 0x231   : > { %v1074_v15 = vpop.permute.xlu1 %1073 }
 0x232   : > { %v1322_v16 = vadd.f32 %v3858_v12, %v1286_v17  ;;  %v1287_v57 = vmul.f32 %v3848_v10, %v1251_v56  ;;  %v1181_v32 = vadd.f32 %v1149_v38, %v3791_v52  ;;  %v1150_v58 = vadd.f32 %v1074_v15, %v3767_v41 }
 0x233   : > { %v1551_v35 = vpop.permute.xlu0 %1550  ;;  %v1440_v51 = vld [vmem:[#allocation2 + $0xc1] sm:$0xff] }
 0x234   : > { %1354 = vst.msk [vmem:[#allocation2 + $0xd9] sm:$0xff] %vm199_vm0, %v1322_v16  ;;  %v1323_v39 = vadd.f32 %v3858_v12, %v1287_v57  ;;  %v1220_v30 = vadd.f32 %v3837_v33, %v1181_v32  ;;  %v1182_v24 = vadd.f32 %v1150_v58, %v3797_v55  ;;  %v1588_v28 = vsel %vm199_vm0, %v1406_v37, %v1551_v35  ;;  %v1373_v57 = vld [vmem:[#allocation2 + $0x20] sm:$0xff]  ;;  %v1372_v32 = vld [vmem:[#allocation2 + $0x18] sm:$0xff] }
 0x235   : > { %1889 = vmatmul.mubr.bf16.vlgmr.msra.gmra.mrb[0].mxu1 %v1588_v28  ;;  %v1441_v46 = vld [vmem:[#allocation2 + $0xc9] sm:$0xff]  ;;  %v1482_v58 = vld [vmem:[#allocation2 + $0x32] sm:$0xff]  ;;  %v1483_v35 = vld [vmem:[#allocation2 + $0x3a] sm:$0xff] }
 0x236   : > { %1355 = vst.msk [vmem:[#allocation2 + $0xe1] sm:$0xff] %vm199_vm0, %v1323_v39  ;;  %v1252_v52 = vmax.f32 %v1220_v30, 0.0  ;;  %v1221_v41 = vadd.f32 %v3837_v33, %v1182_v24  ;;  %3172 = vmatprep.mubr.msk.bf16.mxu1 %vm199_vm0, %v1515_v23  ;;  %v1468_v0 = vpack.c.bf16 %v1441_v46, %v1440_v51  ;;  %v1407_v23 = vpack.c.bf16 %v1373_v57, %v1372_v32  ;;  %v1375_v51 = vld [vmem:[#allocation2 + $0x38] sm:$0xff]  ;;  %v1379_v57 = vld [vmem:[#allocation2 + $0x68] sm:$0xff] }
 0x237   : > { %v1076_v44 = vpop.permute.xlu1 %1075  ;;  %v1516_v24 = vpack.c.bf16 %v1483_v35, %v1482_v58  ;;  %v4890_v46 = vld [vmem:[#allocation4_spill] sm:$0xff] }
 0x238   : > { %v1288_v5 = vmul.f32 %v3848_v10, %v1252_v52  ;;  %v1253_v61 = vmax.f32 %v1221_v41, 0.0  ;;  %v1151_v22 = vadd.f32 %v1076_v44, %v3773_v43  ;;  %1566 = vrot.lane.b32.xlu0 %v1468_v0, %s3279_s17  ;;  %v1374_v41 = vld [vmem:[#allocation2 + $0x30] sm:$0xff]  ;;  %v1488_v35 = vld [vmem:[#allocation2 + $0x7a] sm:$0xff] }
 0x239   : > { %v1078_v55 = vpop.permute.xlu0 %1077  ;;  %v1484_v0 = vld [vmem:[#allocation2 + $0x4a] sm:$0xff]  ;;  %v1485_v44 = vld [vmem:[#allocation2 + $0x52] sm:$0xff] }
 0x23a   : > { %v1324_v40 = vadd.f32 %v3858_v12, %v1288_v5  ;;  %v1289_v59 = vmul.f32 %v3848_v10, %v1253_v61  ;;  %v1183_v3 = vadd.f32 %v1151_v22, %v3803_v21  ;;  %v1152_v25 = vadd.f32 %v1078_v55, %v3779_v49  ;;  %v4891_v5 = vld [vmem:[#allocation8_spill] sm:$0xff] }
 0x23b   : > { %v1442_v43 = vld [vmem:[#allocation2 + $0xd9] sm:$0xff]  ;;  %v1408_v22 = vpack.c.bf16 %v1375_v51, %v1374_v41 }
 0x23c   : > { %1356 = vst.msk [vmem:[#allocation2 + $0xf1] sm:$0xff] %vm199_vm0, %v1324_v40  ;;  %v1325_v47 = vadd.f32 %v3858_v12, %v1289_v59  ;;  %v1222_v2 = vadd.f32 %v3837_v33, %v1183_v3  ;;  %v1184_v48 = vadd.f32 %v1152_v25, %v4887_v42  ;;  %v4892_v3 = vld [vmem:[#allocation5_spill] sm:$0xff] }
 0x23d   : > { %v1443_v63 = vld [vmem:[#allocation2 + $0xe1] sm:$0xff] }
 0x23e   : > { %1357 = vst.msk [vmem:[#allocation2 + $0xf9] sm:$0xff] %vm199_vm0, %v1325_v47  ;;  %v1254_v31 = vmax.f32 %v1222_v2, 0.0  ;;  %v1223_v14 = vadd.f32 %v3837_v33, %v1184_v48  ;;  %v1469_v4 = vpack.c.bf16 %v1443_v63, %v1442_v43  ;;  %v1517_v2 = vpack.c.bf16 %v1485_v44, %v1484_v0  ;;  %v4893_v48 = vld [vmem:[#allocation9_spill] sm:$0xff] }
 0x23f   : > { %v1080_v53 = vpop.permute.xlu0 %1079 }
 0x240   : > { %v1290_v21 = vmul.f32 %v3848_v10, %v1254_v31  ;;  %v1255_v49 = vmax.f32 %v1223_v14, 0.0  ;;  %v1153_v11 = vadd.f32 %v1080_v53, %v4888_v36  ;;  %1568 = vrot.lane.b32.xlu1 %v1469_v4, %s3279_s17  ;;  %v1377_v31 = vld [vmem:[#allocation2 + $0x50] sm:$0xff]  ;;  %v1376_v36 = vld [vmem:[#allocation2 + $0x48] sm:$0xff] }
 0x242   : > { %v1326_v34 = vadd.f32 %v3858_v12, %v1290_v21  ;;  %v1291_v20 = vmul.f32 %v3848_v10, %v1255_v49  ;;  %v1185_v7 = vadd.f32 %v1153_v11, %v4889_v19  ;;  %v1486_v21 = vld [vmem:[#allocation2 + $0x62] sm:$0xff]  ;;  %v1487_v49 = vld [vmem:[#allocation2 + $0x6a] sm:$0xff] }
 0x243   : > { %v1444_v54 = vld [vmem:[#allocation2 + $0xf1] sm:$0xff] }
 0x244   : > { %1358 = vst.msk [vmem:[#allocation2 + $0x109] sm:$0xff] %vm199_vm0, %v1326_v34  ;;  %v1327_v9 = vadd.f32 %v3858_v12, %v1291_v20  ;;  %v1224_v45 = vadd.f32 %v3837_v33, %v1185_v7  ;;  %v4894_v20 = vld [vmem:[#allocation10_spill] sm:$0xff]  ;;  %v1409_v7 = vpack.c.bf16 %v1377_v31, %v1376_v36  ;;  %v1491_v31 = vld [vmem:[#allocation2 + $0x9a] sm:$0xff] }
 0x245   : > { %v1445_v17 = vld [vmem:[#allocation2 + $0xf9] sm:$0xff] }
 0x246   : > { %1359 = vst.msk [vmem:[#allocation2 + $0x111] sm:$0xff] %vm199_vm0, %v1327_v9  ;;  %v1256_v56 = vmax.f32 %v1224_v45, 0.0  ;;  %v1470_v38 = vpack.c.bf16 %v1445_v17, %v1444_v54  ;;  %v1518_v54 = vpack.c.bf16 %v1487_v49, %v1486_v21  ;;  %v4898_v21 = vld [vmem:[#allocation14_spill] sm:$0xff] }
 0x248   : > { %v1292_v37 = vmul.f32 %v3848_v10, %v1256_v56  ;;  %1570 = vrot.lane.b32.xlu0 %v1470_v38, %s3279_s17 }
 0x24a   : > { %v1328_v50 = vadd.f32 %v3858_v12, %v1292_v37 }
 0x24b   : > { %v1446_v26 = vld [vmem:[#allocation2 + $0x109] sm:$0xff] }
 0x24c   : > { %1360 = vst.msk [vmem:[#allocation2 + $0x121] sm:$0xff] %vm199_vm0, %v1328_v50 }
 0x24d   : > { %v1447_v15 = vld [vmem:[#allocation2 + $0x111] sm:$0xff] }
 0x24e   : > { %v1471_v16 = vpack.c.bf16 %v1447_v15, %v1446_v26  ;;  %v4895_v26 = vld [vmem:[#allocation11_spill] sm:$0xff] }
 0x250   : > { %1572 = vrot.lane.b32.xlu1 %v1471_v16, %s3279_s17 }
 0x272   : > { %v1553_v39 = vpop.permute.xlu1 %1552 }
 0x273   : > { %v1592_v30 = vsel %vm199_vm0, %v1407_v23, %v1553_v39  ;;  %v1489_v23 = vld [vmem:[#allocation2 + $0x82] sm:$0xff] }
 0x274   : > { %1897 = vmatmul.mubr.bf16.gmra.mrb[4].mxu1 %v1592_v30  ;;  %v1378_v39 = vld [vmem:[#allocation2 + $0x60] sm:$0xff]  ;;  %v1519_v0 = vpack.c.bf16 %v1489_v23, %v1488_v35 }
 0x275   : > { %3173 = vmatprep.mubr.msk.bf16.mxu1 %vm199_vm0, %v1516_v24 }
 0x276   : > { %v1082_v28 = vpop.permute.xlu1 %1081 }
 0x277   : > { %v1154_v52 = vadd.f32 %v1082_v28, %v4890_v46  ;;  %v4896_v28 = vld [vmem:[#allocation12_spill] sm:$0xff]  ;;  %v1410_v46 = vpack.c.bf16 %v1379_v57, %v1378_v39 }
 0x278   : > { %v1493_v57 = vld [vmem:[#allocation2 + $0xb2] sm:$0xff] }
 0x279   : > { %v1186_v61 = vadd.f32 %v1154_v52, %v4891_v5 }
 0x27a   : > { %v1555_v55 = vpop.permute.xlu0 %1554  ;;  %v1084_v40 = vpop.permute.xlu1 %1083 }
 0x27b   : > { %v1225_v59 = vadd.f32 %v3837_v33, %v1186_v61  ;;  %v1155_v25 = vadd.f32 %v1084_v40, %v4892_v3  ;;  %v1596_v47 = vsel %vm199_vm0, %v1408_v22, %v1555_v55  ;;  %v1448_v55 = vld [vmem:[#allocation2 + $0x121] sm:$0xff] }
 0x27c   : > { %1905 = vmatmul.mubr.bf16.gmra.mrb[8].mxu1 %v1596_v47 }
 0x27d   : > { %v1257_v42 = vmax.f32 %v1225_v59, 0.0  ;;  %v1187_v43 = vadd.f32 %v1155_v25, %v4893_v48  ;;  %3174 = vmatprep.mubr.msk.bf16.mxu1 %vm199_vm0, %v1517_v2  ;;  %v4897_v25 = vld [vmem:[#allocation13_spill] sm:$0xff] }
 0x27e   : > { %v1086_v63 = vpop.permute.xlu0 %1085 }
 0x27f   : > { %v1293_v14 = vmul.f32 %v3848_v10, %v1257_v42  ;;  %v1226_v4 = vadd.f32 %v3837_v33, %v1187_v43  ;;  %v1156_v53 = vadd.f32 %v1086_v63, %v3805_v60  ;;  %v1381_v42 = vld [vmem:[#allocation2 + $0x80] sm:$0xff]  ;;  %v1490_v63 = vld [vmem:[#allocation2 + $0x92] sm:$0xff] }
 0x281   : > { %v1329_v11 = vadd.f32 %v3858_v12, %v1293_v14  ;;  %v1258_v34 = vmax.f32 %v1226_v4, 0.0  ;;  %v1188_v19 = vadd.f32 %v1156_v53, %v4894_v20  ;;  %v1380_v14 = vld [vmem:[#allocation2 + $0x78] sm:$0xff]  ;;  %v1520_v20 = vpack.c.bf16 %v1491_v31, %v1490_v63 }
 0x282   : > { %v1557_v9 = vpop.permute.xlu1 %1556  ;;  %v1088_v45 = vpop.permute.xlu0 %1087  ;;  %v1411_v36 = vpack.c.bf16 %v1381_v42, %v1380_v14  ;;  %v1387_v42 = vld [vmem:[#allocation2 + $0xc8] sm:$0xff] }
 0x283   : > { %1361 = vst.msk [vmem:[#allocation2 + $0x129] sm:$0xff] %vm199_vm0, %v1329_v11  ;;  %v1294_v17 = vmul.f32 %v3848_v10, %v1258_v34  ;;  %v1227_v56 = vadd.f32 %v3837_v33, %v1188_v19  ;;  %v1157_v60 = vadd.f32 %v1088_v45, %v3809_v62  ;;  %v1600_v38 = vsel %vm199_vm0, %v1409_v7, %v1557_v9 }
 0x284   : > { %1915 = vmatmul.mubr.bf16.gmra.mrb[12].mxu1 %v1600_v38 }
 0x285   : > { %v1330_v37 = vadd.f32 %v3858_v12, %v1294_v17  ;;  %v1259_v50 = vmax.f32 %v1227_v56, 0.0  ;;  %v1189_v15 = vadd.f32 %v1157_v60, %v4895_v26  ;;  %3175 = vmatprep.mubr.msk.bf16.mxu1 %vm199_vm0, %v1518_v54 }
 0x286   : > { %v1090_v16 = vpop.permute.xlu1 %1089 }
 0x287   : > { %1362 = vst.msk [vmem:[#allocation2 + $0x139] sm:$0xff] %vm199_vm0, %v1330_v37  ;;  %v1295_v32 = vmul.f32 %v3848_v10, %v1259_v50  ;;  %v1228_v58 = vadd.f32 %v3837_v33, %v1189_v15  ;;  %v1158_v62 = vadd.f32 %v1090_v16, %v3813_v1  ;;  %v1383_v50 = vld [vmem:[#allocation2 + $0x98] sm:$0xff]  ;;  %v1492_v16 = vld [vmem:[#allocation2 + $0xaa] sm:$0xff] }
 0x289   : > { %v1331_v30 = vadd.f32 %v3858_v12, %v1295_v32  ;;  %v1260_v24 = vmax.f32 %v1228_v58, 0.0  ;;  %v1190_v51 = vadd.f32 %v1158_v62, %v4896_v28  ;;  %v1382_v32 = vld [vmem:[#allocation2 + $0x90] sm:$0xff] }
 0x28a   : > { %v1559_v52 = vpop.permute.xlu0 %1558  ;;  %v1092_v41 = vpop.permute.xlu1 %1091  ;;  %v1449_v44 = vld [vmem:[#allocation2 + $0x129] sm:$0xff]  ;;  %v1412_v35 = vpack.c.bf16 %v1383_v50, %v1382_v32 }
 0x28b   : > { %1363 = vst.msk [vmem:[#allocation2 + $0x141] sm:$0xff] %vm199_vm0, %v1331_v30  ;;  %v1296_v5 = vmul.f32 %v3848_v10, %v1260_v24  ;;  %v1229_v61 = vadd.f32 %v3837_v33, %v1190_v51  ;;  %v1159_v1 = vadd.f32 %v1092_v41, %v3817_v6  ;;  %v1604_v22 = vsel %vm199_vm0, %v1410_v46, %v1559_v52  ;;  %v1393_v50 = vld [vmem:[#allocation2 + $0x110] sm:$0xff] }
 0x28c   : > { %1925 = vmatmul.mubr.bf16.gmra.mrb[16].mxu1 %v1604_v22  ;;  %v1472_v40 = vpack.c.bf16 %v1449_v44, %v1448_v55  ;;  %v1521_v24 = vpack.c.bf16 %v1493_v57, %v1492_v16  ;;  %v1384_v44 = vld [vmem:[#allocation2 + $0xa8] sm:$0xff]  ;;  %v1458_v22 = vld [vmem:[#allocation2 + $0x199] sm:$0xff] }
 0x28d   : > { %v1332_v59 = vadd.f32 %v3858_v12, %v1296_v5  ;;  %v1261_v3 = vmax.f32 %v1229_v61, 0.0  ;;  %v1191_v47 = vadd.f32 %v1159_v1, %v4897_v25  ;;  %3176 = vmatprep.mubr.msk.bf16.mxu1 %vm199_vm0, %v1519_v0  ;;  %v1494_v5 = vld [vmem:[#allocation2 + $0xc2] sm:$0xff]  ;;  %v1495_v61 = vld [vmem:[#allocation2 + $0xca] sm:$0xff] }
 0x28e   : > { %1574 = vrot.lane.b32.xlu0 %v1472_v40, %s3279_s17  ;;  %v1094_v2 = vpop.permute.xlu0 %1093  ;;  %v1450_v54 = vld [vmem:[#allocation2 + $0x139] sm:$0xff] }
 0x28f   : > { %1364 = vst.msk [vmem:[#allocation2 + $0x151] sm:$0xff] %vm199_vm0, %v1332_v59  ;;  %v1297_v6 = vmul.f32 %v3848_v10, %v1261_v3  ;;  %v1230_v48 = vadd.f32 %v3837_v33, %v1191_v47  ;;  %v1160_v43 = vadd.f32 %v1094_v2, %v3821_v8  ;;  %v1459_v3 = vld [vmem:[#allocation2 + $0x1a1] sm:$0xff]  ;;  %v1522_v47 = vpack.c.bf16 %v1495_v61, %v1494_v5 }
 0x291   : > { %v1333_v4 = vadd.f32 %v3858_v12, %v1297_v6  ;;  %v1262_v53 = vmax.f32 %v1230_v48, 0.0  ;;  %v1192_v49 = vadd.f32 %v1160_v43, %v4898_v21  ;;  %v1496_v6 = vld [vmem:[#allocation2 + $0xda] sm:$0xff]  ;;  %v1497_v48 = vld [vmem:[#allocation2 + $0xe2] sm:$0xff] }
 0x292   : > { %v1561_v11 = vpop.permute.xlu1 %1560  ;;  %v1096_v34 = vpop.permute.xlu0 %1095  ;;  %v1451_v19 = vld [vmem:[#allocation2 + $0x141] sm:$0xff] }
 0x293   : > { %1365 = vst.msk [vmem:[#allocation2 + $0x159] sm:$0xff] %vm199_vm0, %v1333_v4  ;;  %v1298_v7 = vmul.f32 %v3848_v10, %v1262_v53  ;;  %v1231_v9 = vadd.f32 %v3837_v33, %v1192_v49  ;;  %v1161_v8 = vadd.f32 %v1096_v34, %v3825_v13  ;;  %v1608_v45 = vsel %vm199_vm0, %v1411_v36, %v1561_v11  ;;  %v1389_v49 = vld [vmem:[#allocation2 + $0xe0] sm:$0xff]  ;;  %v1388_v36 = vld [vmem:[#allocation2 + $0xd8] sm:$0xff] }
 0x294   : > { %1935 = vmatmul.mubr.bf16.gmra.mrb[20].mxu1 %v1608_v45  ;;  %v1473_v17 = vpack.c.bf16 %v1451_v19, %v1450_v54  ;;  %v1523_v53 = vpack.c.bf16 %v1497_v48, %v1496_v6  ;;  %v1498_v11 = vld [vmem:[#allocation2 + $0xf2] sm:$0xff]  ;;  %v1499_v34 = vld [vmem:[#allocation2 + $0xfa] sm:$0xff]  ;;  %v1500_v54 = vld [vmem:[#allocation2 + $0x10a] sm:$0xff] }
 0x295   : > { %v1334_v56 = vadd.f32 %v3858_v12, %v1298_v7  ;;  %v1263_v60 = vmax.f32 %v1231_v9, 0.0  ;;  %v1193_v38 = vadd.f32 %v1161_v8, %v3933_v27  ;;  %3177 = vmatprep.mubr.msk.bf16.mxu1 %vm199_vm0, %v1520_v20  ;;  %v1415_v20 = vpack.c.bf16 %v1389_v49, %v1388_v36  ;;  %v1391_v8 = vld [vmem:[#allocation2 + $0xf8] sm:$0xff]  ;;  %v1390_v45 = vld [vmem:[#allocation2 + $0xf0] sm:$0xff] }
 0x296   : > { %1576 = vrot.lane.b32.xlu1 %v1473_v17, %s3279_s17  ;;  %v1098_v37 = vpop.permute.xlu1 %1097  ;;  %v1452_v39 = vld [vmem:[#allocation2 + $0x151] sm:$0xff]  ;;  %v1524_v9 = vpack.c.bf16 %v1499_v34, %v1498_v11 }
 0x297   : > { %1366 = vst.msk [vmem:[#allocation2 + $0x169] sm:$0xff] %vm199_vm0, %v1334_v56  ;;  %v1299_v13 = vmul.f32 %v3848_v10, %v1263_v60  ;;  %v1232_v26 = vadd.f32 %v3837_v33, %v1193_v38  ;;  %v1162_v15 = vadd.f32 %v1098_v37, %v3829_v29  ;;  %v1501_v17 = vld [vmem:[#allocation2 + $0x112] sm:$0xff]  ;;  %v1416_v56 = vpack.c.bf16 %v1391_v8, %v1390_v45 }
 0x298   : > { %v1525_v37 = vpack.c.bf16 %v1501_v17, %v1500_v54 }
 0x299   : > { %v1335_v58 = vadd.f32 %v3858_v12, %v1299_v13  ;;  %v1264_v27 = vmax.f32 %v1232_v26, 0.0  ;;  %v1194_v62 = vadd.f32 %v1162_v15, %v3937_v18  ;;  %v1385_v18 = vld [vmem:[#allocation2 + $0xb0] sm:$0xff]  ;;  %v1392_v13 = vld [vmem:[#allocation2 + $0x108] sm:$0xff] }
 0x29a   : > { %v1563_v23 = vpop.permute.xlu0 %1562  ;;  %v1453_v30 = vld [vmem:[#allocation2 + $0x159] sm:$0xff]  ;;  %v1413_v1 = vpack.c.bf16 %v1385_v18, %v1384_v44  ;;  %v1502_v26 = vld [vmem:[#allocation2 + $0x122] sm:$0xff]  ;;  %v1503_v15 = vld [vmem:[#allocation2 + $0x12a] sm:$0xff]  ;;  %v1417_v16 = vpack.c.bf16 %v1393_v50, %v1392_v13 }
 0x29b   : > { %1367 = vst.msk [vmem:[#allocation2 + $0x171] sm:$0xff] %vm199_vm0, %v1335_v58  ;;  %v1300_v28 = vmul.f32 %v3848_v10, %v1264_v27  ;;  %v1233_v51 = vadd.f32 %v3837_v33, %v1194_v62  ;;  %v1612_v29 = vsel %vm199_vm0, %v1412_v35, %v1563_v23  ;;  %v1474_v46 = vpack.c.bf16 %v1453_v30, %v1452_v39  ;;  %v1395_v27 = vld [vmem:[#allocation2 + $0x128] sm:$0xff]  ;;  %v1394_v62 = vld [vmem:[#allocation2 + $0x120] sm:$0xff] }
 0x29c   : > { %1945 = vmatmul.mubr.bf16.gmra.mrb[24].mxu1 %v1612_v29  ;;  %v1526_v58 = vpack.c.bf16 %v1503_v15, %v1502_v26  ;;  %v1504_v35 = vld [vmem:[#allocation2 + $0x13a] sm:$0xff]  ;;  %v1505_v23 = vld [vmem:[#allocation2 + $0x142] sm:$0xff]  ;;  %v1418_v39 = vpack.c.bf16 %v1395_v27, %v1394_v62 }
 0x29d   : > { %v1336_v52 = vadd.f32 %v3858_v12, %v1300_v28  ;;  %v1265_v41 = vmax.f32 %v1233_v51, 0.0  ;;  %1578 = vrot.lane.b32.xlu0 %v1474_v46, %s3279_s17  ;;  %3178 = vmatprep.mubr.msk.bf16.mxu1 %vm199_vm0, %v1521_v24  ;;  %v1527_v28 = vpack.c.bf16 %v1505_v23, %v1504_v35  ;;  %v1397_v51 = vld [vmem:[#allocation2 + $0x140] sm:$0xff]  ;;  %v1396_v29 = vld [vmem:[#allocation2 + $0x138] sm:$0xff] }
 0x29e   : > { %v1454_v40 = vld [vmem:[#allocation2 + $0x169] sm:$0xff]  ;;  %v1506_v46 = vld [vmem:[#allocation2 + $0x152] sm:$0xff] }
 0x29f   : > { %1368 = vst.msk [vmem:[#allocation2 + $0x181] sm:$0xff] %vm199_vm0, %v1336_v52  ;;  %v1301_v0 = vmul.f32 %v3848_v10, %v1265_v41  ;;  %v1477_v10 = vpack.c.bf16 %v1459_v3, %v1458_v22  ;;  %v1507_v52 = vld [vmem:[#allocation2 + $0x15a] sm:$0xff]  ;;  %v1419_v41 = vpack.c.bf16 %v1397_v51, %v1396_v29 }
 0x2a0   : > { %v1528_v5 = vpack.c.bf16 %v1507_v52, %v1506_v46 }
 0x2a1   : > { %v1337_v33 = vadd.f32 %v3858_v12, %v1301_v0  ;;  %v1386_v12 = vld [vmem:[#allocation2 + $0xc0] sm:$0xff] }
 0x2a2   : > { %v1565_v55 = vpop.permute.xlu1 %1564  ;;  %v1455_v59 = vld [vmem:[#allocation2 + $0x171] sm:$0xff]  ;;  %v1414_v43 = vpack.c.bf16 %v1387_v42, %v1386_v12  ;;  %v1400_v42 = vld [vmem:[#allocation2 + $0x168] sm:$0xff] }
 0x2a3   : > { %1369 = vst.msk [vmem:[#allocation2 + $0x189] sm:$0xff] %vm199_vm0, %v1337_v33  ;;  %v1616_v25 = vsel %vm199_vm0, %v1413_v1, %v1565_v55  ;;  %v1475_v2 = vpack.c.bf16 %v1455_v59, %v1454_v40  ;;  %v1399_v1 = vld [vmem:[#allocation2 + $0x158] sm:$0xff]  ;;  %v1398_v55 = vld [vmem:[#allocation2 + $0x150] sm:$0xff] }
 0x2a4   : > { %1955 = vmatmul.mubr.bf16.gmra.mrb[28].mxu1 %v1616_v25  ;;  %v1420_v40 = vpack.c.bf16 %v1399_v1, %v1398_v55  ;;  %v1508_v59 = vld [vmem:[#allocation2 + $0x16a] sm:$0xff]  ;;  %v1509_v3 = vld [vmem:[#allocation2 + $0x172] sm:$0xff] }
 0x2a5   : > { %3179 = vmatprep.mubr.msk.bf16.mxu1 %vm199_vm0, %v1522_v47  ;;  %1580 = vrot.lane.b32.xlu1 %v1475_v2, %s3279_s17  ;;  %v1529_v2 = vpack.c.bf16 %v1509_v3, %v1508_v59 }
 0x2a6   : > { %v1456_v31 = vld [vmem:[#allocation2 + $0x181] sm:$0xff] }
 0x2a9   : > { %1584 = vrot.lane.b32.xlu1 %v1477_v10, %s3279_s17  ;;  %v1401_v10 = vld [vmem:[#allocation2 + $0x170] sm:$0xff] }
 0x2aa   : > { %v1567_v63 = vpop.permute.xlu0 %1566  ;;  %v1457_v14 = vld [vmem:[#allocation2 + $0x189] sm:$0xff]  ;;  %v1421_v12 = vpack.c.bf16 %v1401_v10, %v1400_v42 }
 0x2ab   : > { %v1620_v4 = vsel %vm199_vm0, %v1414_v43, %v1567_v63  ;;  %v1476_v21 = vpack.c.bf16 %v1457_v14, %v1456_v31  ;;  %v1510_v6 = vld [vmem:[#allocation2 + $0x182] sm:$0xff]  ;;  %v1511_v48 = vld [vmem:[#allocation2 + $0x18a] sm:$0xff] }
 0x2ac   : > { %1965 = vmatmul.mubr.bf16.gmra.mrb[32].mxu1 %v1620_v4  ;;  %v1530_v31 = vpack.c.bf16 %v1511_v48, %v1510_v6  ;;  %v1403_v14 = vld [vmem:[#allocation2 + $0x188] sm:$0xff]  ;;  %v1512_v4 = vld [vmem:[#allocation2 + $0x19a] sm:$0xff] }
 0x2ad   : > { %3180 = vmatprep.mubr.msk.bf16.mxu1 %vm199_vm0, %v1523_v53  ;;  %1582 = vrot.lane.b32.xlu0 %v1476_v21, %s3279_s17  ;;  %v1513_v53 = vld [vmem:[#allocation2 + $0x1a2] sm:$0xff] }
 0x2ae   : > { %v1402_v21 = vld [vmem:[#allocation2 + $0x180] sm:$0xff]  ;;  %v1531_v11 = vpack.c.bf16 %v1513_v53, %v1512_v4 }
 0x2af   : > { %v1422_v49 = vpack.c.bf16 %v1403_v14, %v1402_v21 }
 0x2b2   : > { %v1569_v19 = vpop.permute.xlu1 %1568 }
 0x2b3   : > { %v1624_v7 = vsel %vm199_vm0, %v1415_v20, %v1569_v19  ;;  %v1404_v20 = vld [vmem:[#allocation2 + $0x198] sm:$0xff]  ;;  %v1405_v19 = vld [vmem:[#allocation2 + $0x1a0] sm:$0xff] }
 0x2b4   : > { %1975 = vmatmul.mubr.bf16.gmra.mrb[36].mxu1 %v1624_v7  ;;  %v1423_v7 = vpack.c.bf16 %v1405_v19, %v1404_v20 }
 0x2b5   : > { %3181 = vmatprep.mubr.msk.bf16.mxu1 %vm199_vm0, %v1524_v9 }
 0x2ba   : > { %v1571_v60 = vpop.permute.xlu0 %1570 }
 0x2bb   : > { %v1628_v38 = vsel %vm199_vm0, %v1416_v56, %v1571_v60 }
 0x2bc   : > { %1985 = vmatmul.mubr.bf16.gmra.mrb[40].mxu1 %v1628_v38 }
 0x2bd   : > { %3182 = vmatprep.mubr.msk.bf16.mxu1 %vm199_vm0, %v1525_v37 }
 0x2c2   : > { %v1573_v57 = vpop.permute.xlu1 %1572 }
 0x2c3   : > { %v1632_v32 = vsel %vm199_vm0, %v1417_v16, %v1573_v57 }
 0x2c4   : > { %1995 = vmatmul.mubr.bf16.gmra.mrb[44].mxu1 %v1632_v32 }
 0x2c5   : > { %3183 = vmatprep.mubr.msk.bf16.mxu1 %vm199_vm0, %v1526_v58 }
 0x300   : > { %v1575_v30 = vpop.permute.xlu0 %1574 }
 0x301   : > { %v1636_v24 = vsel %vm199_vm0, %v1418_v39, %v1575_v30 }
 0x302   : > { %2005 = vmatmul.mubr.bf16.gmra.mrb[48].mxu1 %v1636_v24 }
 0x303   : > { %3184 = vmatprep.mubr.msk.bf16.mxu1 %vm199_vm0, %v1527_v28 }
 0x308   : > { %v1577_v18 = vpop.permute.xlu1 %1576  ;;  %v4113_v0 = vpop.f32.mrb[0].mxu1 }
 0x309   : > { %v1640_v44 = vsel %vm199_vm0, %v1419_v41, %v1577_v18  ;;  %v1892_v61 = vpop.f32.mrb[1].mxu1 }
 0x30a   : > { %2015 = vmatmul.mubr.bf16.gmra.mrb[52].mxu1 %v1640_v44  ;;  %v4116_v33 = vpop.f32.mrb[2].mxu1 }
 0x30b   : > { %3185 = vmatprep.mubr.msk.bf16.mxu1 %vm199_vm0, %v1528_v5  ;;  %v1895_v22 = vpop.f32.mrb[3].mxu1 }
 0x30f   : > { %v1579_v25 = vpop.permute.xlu0 %1578 }
 0x310   : > { %v1644_v47 = vsel %vm199_vm0, %v1420_v40, %v1579_v25 }
 0x312   : > { %2025 = vmatmul.mubr.bf16.gmra.mrb[56].mxu1 %v1644_v47 }
 0x313   : > { %3186 = vmatprep.mubr.msk.bf16.mxu1 %vm199_vm0, %v1529_v2 }
 0x317   : > { %v1581_v43 = vpop.permute.xlu1 %1580 }
 0x318   : > { %v1648_v63 = vsel %vm199_vm0, %v1421_v12, %v1581_v43 }
 0x31a   : > { %2035 = vmatmul.mubr.bf16.gmra.mrb[60].mxu1 %v1648_v63 }
 0x31b   : > { %3187 = vmatprep.mubr.msk.bf16.mxu1 %vm199_vm0, %v1530_v31  ;;  %v1585_v9 = vpop.permute.xlu1 %1584 }
 0x31c   : > { %v1656_v8 = vsel %vm199_vm0, %v1423_v7, %v1585_v9 }
 0x31f   : > { %v1583_v36 = vpop.permute.xlu0 %1582 }
 0x320   : > { %v1652_v34 = vsel %vm199_vm0, %v1422_v49, %v1583_v36  ;;  %v4254_v49 = vld [vmem:[%s4868_s3 + $0x3] ss:$0 sm:$0xff] }
 0x322   : > { %2045 = vmatmul.mubr.bf16.gmra.mrb[64].mxu1 %v1652_v34 }
 0x323   : > { %3188 = vmatprep.mubr.msk.bf16.mxu1 %vm199_vm0, %v1531_v11 }
 0x32a   : > { %2055 = vmatmul.mubr.bf16.gmra.mrb[68].mxu1 %v1656_v8  ;;  %v4264_v8 = vld [vmem:[%s4868_s3 + $0x4] ss:$0 sm:$0xff] }
 0x347   : > { %v4126_v45 = vpop.f32.mrb[4].mxu1 }
 0x348   : > { %v1900_v54 = vpop.f32.mrb[5].mxu1  ;;  %2095 = vrot.lane.b32.xlu0 %v4126_v45, %s3279_s17 }
 0x349   : > { %v4130_v17 = vpop.f32.mrb[6].mxu1 }
 0x34a   : > { %v1903_v56 = vpop.f32.mrb[7].mxu1  ;;  %2097 = vrot.lane.b32.xlu1 %v4130_v17, %s3279_s17 }
 0x34f   : > { %v4134_v60 = vpop.f32.mrb[8].mxu1 }
 0x350   : > { %v1908_v38 = vpop.f32.mrb[9].mxu1  ;;  %2099 = vrot.lane.b32.xlu0 %v4134_v60, %s3279_s17 }
 0x351   : > { %v4138_v37 = vpop.f32.mrb[10].mxu1 }
 0x352   : > { %v1912_v50 = vpop.f32.mrb[11].mxu1  ;;  %2101 = vrot.lane.b32.xlu1 %v4138_v37, %s3279_s17 }
 0x357   : > { %v4142_v13 = vpop.f32.mrb[12].mxu1 }
 0x358   : > { %v4144_v26 = vpop.f32.mrb[13].mxu1  ;;  %2103 = vrot.lane.b32.xlu0 %v4142_v13, %s3279_s17 }
 0x359   : > { %v4148_v15 = vpop.f32.mrb[14].mxu1 }
 0x35a   : > { %v1922_v16 = vpop.f32.mrb[15].mxu1  ;;  %2105 = vrot.lane.b32.xlu1 %v4148_v15, %s3279_s17 }
 0x35f   : > { %v4152_v57 = vpop.f32.mrb[16].mxu1 }
 0x360   : > { %v4154_v32 = vpop.f32.mrb[17].mxu1  ;;  %2107 = vrot.lane.b32.xlu0 %v4152_v57, %s3279_s17 }
 0x361   : > { %v4158_v58 = vpop.f32.mrb[18].mxu1 }
 0x362   : > { %v4160_v27 = vpop.f32.mrb[19].mxu1  ;;  %2109 = vrot.lane.b32.xlu1 %v4158_v58, %s3279_s17 }
 0x367   : > { %v4164_v62 = vpop.f32.mrb[20].mxu1 }
 0x368   : > { %v4166_v35 = vpop.f32.mrb[21].mxu1  ;;  %2111 = vrot.lane.b32.xlu0 %v4164_v62, %s3279_s17 }
 0x369   : > { %v4170_v23 = vpop.f32.mrb[22].mxu1 }
 0x36a   : > { %v4172_v39 = vpop.f32.mrb[23].mxu1  ;;  %2113 = vrot.lane.b32.xlu1 %v4170_v23, %s3279_s17 }
 0x36f   : > { %v4176_v30 = vpop.f32.mrb[24].mxu1 }
 0x370   : > { %v4178_v24 = vpop.f32.mrb[25].mxu1  ;;  %2115 = vrot.lane.b32.xlu0 %v4176_v30, %s3279_s17 }
 0x371   : > { %v4182_v28 = vpop.f32.mrb[26].mxu1 }
 0x372   : > { %v4184_v51 = vpop.f32.mrb[27].mxu1  ;;  %2117 = vrot.lane.b32.xlu1 %v4182_v28, %s3279_s17 }
 0x377   : > { %v4188_v29 = vpop.f32.mrb[28].mxu1 }
 0x378   : > { %v4190_v46 = vpop.f32.mrb[29].mxu1  ;;  %2119 = vrot.lane.b32.xlu0 %v4188_v29, %s3279_s17 }
 0x379   : > { %v4194_v52 = vpop.f32.mrb[30].mxu1 }
 0x37a   : > { %v4196_v41 = vpop.f32.mrb[31].mxu1  ;;  %2121 = vrot.lane.b32.xlu1 %v4194_v52, %s3279_s17 }
 0x37f   : > { %v4200_v18 = vpop.f32.mrb[32].mxu1 }
 0x380   : > { %v4202_v44 = vpop.f32.mrb[33].mxu1  ;;  %2123 = vrot.lane.b32.xlu0 %v4200_v18, %s3279_s17 }
 0x381   : > { %v4206_v5 = vpop.f32.mrb[34].mxu1 }
 0x382   : > { %v4208_v61 = vpop.f32.mrb[35].mxu1  ;;  %2125 = vrot.lane.b32.xlu1 %v4206_v5, %s3279_s17 }
 0x387   : > { %v4212_v1 = vpop.f32.mrb[36].mxu1 }
 0x388   : > { %v4214_v22 = vpop.f32.mrb[37].mxu1  ;;  %2127 = vrot.lane.b32.xlu0 %v4212_v1, %s3279_s17 }
 0x389   : > { %v4218_v55 = vpop.f32.mrb[38].mxu1 }
 0x38a   : > { %v4220_v40 = vpop.f32.mrb[39].mxu1  ;;  %2129 = vrot.lane.b32.xlu1 %v4218_v55, %s3279_s17 }
 0x38f   : > { %v4224_v59 = vpop.f32.mrb[40].mxu1 }
 0x390   : > { %v4226_v3 = vpop.f32.mrb[41].mxu1  ;;  %2131 = vrot.lane.b32.xlu0 %v4224_v59, %s3279_s17 }
 0x391   : > { %v4230_v25 = vpop.f32.mrb[42].mxu1 }
 0x392   : > { %v4232_v47 = vpop.f32.mrb[43].mxu1  ;;  %2133 = vrot.lane.b32.xlu1 %v4230_v25, %s3279_s17 }
 0x397   : > { %v4236_v2 = vpop.f32.mrb[44].mxu1 }
 0x398   : > { %v4238_v10 = vpop.f32.mrb[45].mxu1  ;;  %2135 = vrot.lane.b32.xlu0 %v4236_v2, %s3279_s17 }
 0x399   : > { %v4242_v42 = vpop.f32.mrb[46].mxu1 }
 0x39a   : > { %v4244_v12 = vpop.f32.mrb[47].mxu1  ;;  %2137 = vrot.lane.b32.xlu1 %v4242_v42, %s3279_s17 }
 0x3ba   : > { %v2096_v6 = vpop.permute.xlu0 %2095 }
 0x3bb   : > { %v2191_v48 = vadd.f32 %v2096_v6, %v4113_v0 }
 0x3bc   : > { %v2098_v43 = vpop.permute.xlu1 %2097 }
 0x3bd   : > { %v2223_v63 = vadd.f32 %v2191_v48, %v1908_v38  ;;  %v2192_v31 = vadd.f32 %v2098_v43, %v4116_v33 }
 0x3bf   : > { %v2224_v14 = vadd.f32 %v2192_v31, %v1912_v50  ;;  %v2262_v0 = vadd.f32 %v4254_v49, %v2223_v63 }
 0x3c1   : > { %v2263_v20 = vadd.f32 %v4254_v49, %v2224_v14  ;;  %v2294_v7 = vmax.f32 %v2262_v0, 0.0  ;;  %v3280_v14 = vmov 1983009808  }
 0x3c2   : > { %v2100_v4 = vpop.permute.xlu0 %2099 }
 0x3c3   : > { %v2193_v53 = vadd.f32 %v2100_v4, %v4126_v45  ;;  %v2330_v50 = vmul.f32 %v4264_v8, %v2294_v7  ;;  %v2401_v4 = vunpack.c.l.s4 %v3280_v14 }
 0x3c4   : > { %v2102_v21 = vpop.permute.xlu1 %2101 }
 0x3c5   : > { %v2225_v36 = vadd.f32 %v2193_v53, %v4144_v26  ;;  %v2194_v11 = vadd.f32 %v2102_v21, %v4130_v17  ;;  %v2295_v17 = vmax.f32 %v2263_v20, 0.0  ;;  %v2403_v53 = vlaneseq }
 0x3c7   : > { %v2226_v34 = vadd.f32 %v2194_v11, %v1922_v16  ;;  %v2331_v6 = vmul.f32 %v4264_v8, %v2295_v17 }
 0x3c9   : > { %v2265_v31 = vadd.f32 %v4254_v49, %v2226_v34 }
 0x3ca   : > { %v2104_v33 = vpop.permute.xlu0 %2103 }
 0x3cb   : > { %v2195_v19 = vadd.f32 %v2104_v33, %v4134_v60  ;;  %v4274_v60 = vld [vmem:[%s4868_s3 + $0x5] ss:$0 sm:$0xff] }
 0x3cc   : > { %v2106_v9 = vpop.permute.xlu1 %2105  ;;  %v2366_v63 = vadd.f32 %v4274_v60, %v2330_v50  ;;  %v4303_v50 = vshrl.u32 %v2403_v53, 7 }
 0x3cd   : > { %v2227_v45 = vadd.f32 %v2195_v19, %v4154_v32  ;;  %v2196_v54 = vadd.f32 %v2106_v9, %v4138_v37  ;;  %v2264_v32 = vadd.f32 %v4254_v49, %v2225_v36 }
 0x3cf   : > { %v2266_v56 = vadd.f32 %v4254_v49, %v2227_v45  ;;  %v2228_v38 = vadd.f32 %v2196_v54, %v4160_v27  ;;  %v2296_v19 = vmax.f32 %v2264_v32, 0.0 }
 0x3d1   : > { %v2298_v26 = vmax.f32 %v2266_v56, 0.0  ;;  %v2267_v16 = vadd.f32 %v4254_v49, %v2228_v38  ;;  %v2402_v38 = vunpack.c.0.s8 %v2401_v4 }
 0x3d2   : > { %v2108_v37 = vpop.permute.xlu0 %2107 }
 0x3d3   : > { %v2334_v48 = vmul.f32 %v4264_v8, %v2298_v26  ;;  %v2299_v43 = vmax.f32 %v2267_v16, 0.0  ;;  %v2197_v27 = vadd.f32 %v2108_v37, %v4142_v13  ;;  %v2367_v13 = vadd.f32 %v4274_v60, %v2331_v6 }
 0x3d4   : > { %v2110_v21 = vpop.permute.xlu1 %2109  ;;  %v2332_v6 = vmul.f32 %v4264_v8, %v2296_v19  ;;  %v4311_v14 = vsub.s32 %v2402_v38, %v4303_v50 }
 0x3d5   : > { %v2370_v11 = vadd.f32 %v4274_v60, %v2334_v48  ;;  %v2335_v0 = vmul.f32 %v4264_v8, %v2299_v43  ;;  %v2229_v36 = vadd.f32 %v2197_v27, %v4166_v35  ;;  %v4286_v20 = vpop.f32.mrb[48].mxu1  ;;  %v2198_v33 = vadd.f32 %v2110_v21, %v4148_v15 }
 0x3d6   : > { %v4290_v7 = vpop.f32.mrb[49].mxu1  ;;  %2139 = vrot.lane.b32.xlu0 %v4286_v20, %s3279_s17  ;;  %v2297_v35 = vmax.f32 %v2265_v31, 0.0 }
 0x3d7   : > { %v2398_v34 = vcombine.low %v2366_v63, %v2370_v11  ;;  %v2399_v9 = vcombine.high %v2366_v63, %v2370_v11  ;;  %v2371_v45 = vadd.f32 %v4274_v60, %v2335_v0  ;;  %v2268_v54 = vadd.f32 %v4254_v49, %v2229_v36  ;;  %v4296_v17 = vpop.f32.mrb[50].mxu1 }
 0x3d8   : > { %v2230_v56 = vadd.f32 %v2198_v33, %v4172_v39  ;;  %v4299_v15 = vpop.f32.mrb[51].mxu1  ;;  %2141 = vrot.lane.b32.xlu1 %v4296_v17, %s3279_s17  ;;  %v2333_v39 = vmul.f32 %v4264_v8, %v2297_v35  ;;  %v2368_v11 = vadd.f32 %v4274_v60, %v2332_v6 }
 0x3d9   : > { %v2670_v26 = vcombine.low %v2367_v13, %v2371_v45  ;;  %v2671_v16 = vcombine.high %v2367_v13, %v2371_v45  ;;  %v2300_v32 = vmax.f32 %v2268_v54, 0.0  ;;  %v4334_v35 = vrot.slane %v2398_v34, %v4311_v14 }
 0x3da   : > { %v2269_v37 = vadd.f32 %v4254_v49, %v2230_v56  ;;  %v2112_v48 = vpop.permute.xlu0 %2111 }
 0x3db   : > { %v2199_v43 = vadd.f32 %v2112_v48, %v4152_v57  ;;  %v2336_v27 = vmul.f32 %v4264_v8, %v2300_v32 }
 0x3dc   : > { %v2301_v63 = vmax.f32 %v2269_v37, 0.0  ;;  %v2114_v31 = vpop.permute.xlu1 %2113  ;;  %v4343_v37 = vrot.slane %v2399_v9, %v4311_v14 }
 0x3dd   : > { %v2231_v4 = vadd.f32 %v2199_v43, %v4178_v24  ;;  %v4314_v53 = vpop.f32.mrb[52].mxu1  ;;  %v2200_v21 = vadd.f32 %v2114_v31, %v4158_v58  ;;  %v2372_v0 = vadd.f32 %v4274_v60, %v2336_v27  ;;  %v2369_v24 = vadd.f32 %v4274_v60, %v2333_v39 }
 0x3de   : > { %v2337_v57 = vmul.f32 %v4264_v8, %v2301_v63  ;;  %v4320_v36 = vpop.f32.mrb[53].mxu1  ;;  %2143 = vrot.lane.b32.xlu0 %v4314_v53, %s3279_s17  ;;  %v4357_v31 = vrot.slane %v2670_v26, %v4311_v14  ;;  %v3281_v63 = vmov 1934713408  }
 0x3df   : > { %v2232_v33 = vadd.f32 %v2200_v21, %v4184_v51  ;;  %v4325_v13 = vpop.f32.mrb[54].mxu1  ;;  %v2414_v19 = vcombine.low %v2368_v11, %v2372_v0  ;;  %v2415_v45 = vcombine.high %v2368_v11, %v2372_v0  ;;  %v4364_v11 = vrot.slane %v2671_v16, %v4311_v14 }
 0x3e0   : > { %v2373_v58 = vadd.f32 %v4274_v60, %v2337_v57  ;;  %v4329_v54 = vpop.f32.mrb[55].mxu1  ;;  %2145 = vrot.lane.b32.xlu1 %v4325_v13, %s3279_s17  ;;  %v2270_v16 = vadd.f32 %v4254_v49, %v2231_v4 }
 0x3e1   : > { %v4337_v56 = vrot.slane %v2414_v19, %v4311_v14  ;;  %v4340_v51 = vrot.slane %v2415_v45, %v4311_v14 }
 0x3e2   : > { %v2686_v38 = vcombine.low %v2369_v24, %v2373_v58  ;;  %v2687_v6 = vcombine.high %v2369_v24, %v2373_v58  ;;  %v2116_v32 = vpop.permute.xlu0 %2115  ;;  %v2302_v4 = vmax.f32 %v2270_v16, 0.0 }
 0x3e3   : > { %v2201_v48 = vadd.f32 %v2116_v32, %v4164_v62 }
 0x3e4   : > { %v4347_v43 = vrot.slane %v2686_v38, %v4311_v14  ;;  %v4350_v34 = vrot.slane %v2687_v6, %v4311_v14  ;;  %v2118_v39 = vpop.permute.xlu1 %2117  ;;  %v2271_v38 = vadd.f32 %v4254_v49, %v2232_v33 }
 0x3e5   : > { %v2233_v9 = vadd.f32 %v2201_v48, %v4190_v46  ;;  %v4360_v21 = vpop.f32.mrb[56].mxu1  ;;  %v2202_v62 = vadd.f32 %v2118_v39, %v4170_v23 }
 0x3e6   : > { %v4366_v0 = vpop.f32.mrb[57].mxu1  ;;  %2147 = vrot.lane.b32.xlu0 %v4360_v21, %s3279_s17  ;;  %v2303_v45 = vmax.f32 %v2271_v38, 0.0 }
 0x3e7   : > { %v2234_v46 = vadd.f32 %v2202_v62, %v4196_v41  ;;  %v4375_v24 = vpop.f32.mrb[58].mxu1 }
 0x3e8   : > { %v4380_v19 = vpop.f32.mrb[59].mxu1  ;;  %2149 = vrot.lane.b32.xlu1 %v4375_v24, %s3279_s17  ;;  %v2339_v38 = vmul.f32 %v4264_v8, %v2303_v45 }
 0x3ea   : > { %v2120_v6 = vpop.permute.xlu0 %2119 }
 0x3eb   : > { %v2203_v32 = vadd.f32 %v2120_v6, %v4176_v30  ;;  %v2338_v30 = vmul.f32 %v4264_v8, %v2302_v4  ;;  %v2272_v6 = vadd.f32 %v4254_v49, %v2233_v9 }
 0x3ec   : > { %v2122_v48 = vpop.permute.xlu1 %2121 }
 0x3ed   : > { %v2235_v39 = vadd.f32 %v2203_v32, %v4202_v44  ;;  %v2204_v62 = vadd.f32 %v2122_v48, %v4182_v28  ;;  %v4394_v23 = vpop.f32.mrb[60].mxu1  ;;  %v4415_v4 = vadd.f32 %v4274_v60, %v2338_v30 }
 0x3ee   : > { %4899 = vst [vmem:[#allocation6_spill] sm:$0xff] %v4394_v23  ;;  %v4396_v26 = vpop.f32.mrb[61].mxu1  ;;  %2151 = vrot.lane.b32.xlu0 %v4394_v23, %s3279_s17 }
 0x3ef   : > { %v2274_v41 = vadd.f32 %v4254_v49, %v2235_v39  ;;  %v2236_v33 = vadd.f32 %v2204_v62, %v4208_v61  ;;  %v4402_v58 = vpop.f32.mrb[62].mxu1  ;;  %v2273_v62 = vadd.f32 %v4254_v49, %v2234_v46 }
 0x3f0   : > { %4900 = vst [vmem:[#allocation3_spill] sm:$0xff] %v4402_v58  ;;  %2153 = vrot.lane.b32.xlu1 %v4402_v58, %s3279_s17  ;;  %v4407_v28 = vpop.f32.mrb[63].mxu1 }
 0x3f1   : > { %v2306_v44 = vmax.f32 %v2274_v41, 0.0  ;;  %v2275_v16 = vadd.f32 %v4254_v49, %v2236_v33  ;;  %v2465_v41 = vunpack.c.l.s4 %v3281_v63 }
 0x3f2   : > { %v2124_v32 = vpop.permute.xlu0 %2123 }
 0x3f3   : > { %v2342_v48 = vmul.f32 %v4264_v8, %v2306_v44  ;;  %v2307_v61 = vmax.f32 %v2275_v16, 0.0  ;;  %v2205_v39 = vadd.f32 %v2124_v32, %v4188_v29  ;;  %v4423_v16 = vadd.f32 %v4274_v60, %v2339_v38 }
 0x3f4   : > { %v2126_v57 = vpop.permute.xlu1 %2125  ;;  %v2304_v29 = vmax.f32 %v2272_v6, 0.0 }
 0x3f5   : > { %v2378_v33 = vadd.f32 %v4274_v60, %v2342_v48  ;;  %v2343_v45 = vmul.f32 %v4264_v8, %v2307_v61  ;;  %v2237_v9 = vadd.f32 %v2205_v39, %v4214_v22  ;;  %v2206_v27 = vadd.f32 %v2126_v57, %v4194_v52  ;;  %v2046_v44 = vpop.f32.mrb[64].mxu1 }
 0x3f6   : > { %2155 = vrot.lane.b32.xlu0 %v2046_v44, %s3279_s17  ;;  %v4426_v30 = vpop.f32.mrb[65].mxu1  ;;  %v2305_v61 = vmax.f32 %v2273_v62, 0.0  ;;  %v2466_v39 = vunpack.c.0.s8 %v2465_v41  ;;  %v2340_v44 = vmul.f32 %v4264_v8, %v2304_v29 }
 0x3f7   : > { %v2430_v46 = vcombine.low %v4415_v4, %v2378_v33  ;;  %v2431_v63 = vcombine.high %v4415_v4, %v2378_v33  ;;  %v2379_v32 = vadd.f32 %v4274_v60, %v2343_v45  ;;  %v2276_v48 = vadd.f32 %v4254_v49, %v2237_v9  ;;  %v2050_v22 = vpop.f32.mrb[66].mxu1 }
 0x3f8   : > { %v2238_v52 = vadd.f32 %v2206_v27, %v4220_v40  ;;  %2157 = vrot.lane.b32.xlu1 %v2050_v22, %s3279_s17  ;;  %v4434_v57 = vpop.f32.mrb[67].mxu1  ;;  %v2341_v62 = vmul.f32 %v4264_v8, %v2305_v61  ;;  %v4446_v41 = vsub.s32 %v2466_v39, %v4303_v50  ;;  %v2376_v29 = vadd.f32 %v4274_v60, %v2340_v44 }
 0x3f9   : > { %v2702_v38 = vcombine.low %v4423_v16, %v2379_v32  ;;  %v2703_v6 = vcombine.high %v4423_v16, %v2379_v32  ;;  %v2308_v4 = vmax.f32 %v2276_v48, 0.0  ;;  %v2438_v39 = vrot.slane %v2430_v46, %v4311_v14 }
 0x3fa   : > { %v2277_v33 = vadd.f32 %v4254_v49, %v2238_v52  ;;  %v2128_v45 = vpop.permute.xlu0 %2127  ;;  %v4901_v44 = vcombine.low %v4334_v35, %v4337_v56 }
 0x3fb   : > { %v2207_v9 = vadd.f32 %v2128_v45, %v4200_v18  ;;  %v2344_v40 = vmul.f32 %v4264_v8, %v2308_v4  ;;  %v2377_v4 = vadd.f32 %v4274_v60, %v2341_v62 }
 0x3fc   : > { %v2309_v27 = vmax.f32 %v2277_v33, 0.0  ;;  %v2130_v22 = vpop.permute.xlu1 %2129  ;;  %v4463_v45 = vrot.slane %v4901_v44, %v4446_v41 }
 0x3fd   : > { %v2239_v58 = vadd.f32 %v2207_v9, %v4226_v3  ;;  %v2208_v23 = vadd.f32 %v2130_v22, %v4206_v5  ;;  %v2056_v16 = vpop.f32.mrb[68].mxu1  ;;  %v2380_v32 = vadd.f32 %v4274_v60, %v2344_v40 }
 0x3fe   : > { %v2345_v18 = vmul.f32 %v4264_v8, %v2309_v27  ;;  %v4451_v48 = vpop.f32.mrb[69].mxu1  ;;  %v4903_v16 = vcombine.low %v4343_v37, %v4340_v51 }
 0x3ff   : > { %v2240_v61 = vadd.f32 %v2208_v23, %v4232_v47  ;;  %v2059_v52 = vpop.f32.mrb[70].mxu1  ;;  %v2446_v3 = vcombine.low %v2376_v29, %v2380_v32  ;;  %v2447_v33 = vcombine.high %v2376_v29, %v2380_v32  ;;  %v4902_v47 = vcombine.high %v4334_v35, %v4337_v56 }
 0x400   : > { %v2381_v5 = vadd.f32 %v4274_v60, %v2345_v18  ;;  %v4456_v50 = vpop.f32.mrb[71].mxu1  ;;  %v4478_v29 = vrot.slane %v4903_v16, %v4446_v41  ;;  %v4904_v35 = vcombine.high %v4343_v37, %v4340_v51  ;;  %v4905_v32 = vcombine.low %v4357_v31, %v4347_v43 }
 0x401   : > { %v4469_v23 = vrot.slane %v4902_v47, %v4446_v41  ;;  %v2454_v9 = vrot.slane %v2446_v3, %v4311_v14  ;;  %v2461_v62 = vrot.slane %v2447_v33, %v4311_v14  ;;  %v2717_v16 = vrot.slane %v2703_v6, %v4311_v14 }
 0x402   : > { %v2718_v40 = vcombine.low %v2377_v4, %v2381_v5  ;;  %v2719_v27 = vcombine.high %v2377_v4, %v2381_v5  ;;  %v2132_v22 = vpop.permute.xlu0 %2131  ;;  %v4484_v56 = vrot.slane %v4904_v35, %v4446_v41  ;;  %v4490_v18 = vrot.slane %v4905_v32, %v4446_v41 }
 0x403   : > { %v2209_v46 = vadd.f32 %v2132_v22, %v4212_v1  ;;  %v2445_v1 = vrot.slane %v2431_v63, %v4311_v14  ;;  %v2494_v3 = vcombine.low %v2438_v39, %v2454_v9  ;;  %v2495_v33 = vcombine.high %v2438_v39, %v2454_v9 }
 0x404   : > { %v2726_v52 = vrot.slane %v2718_v40, %v4311_v14  ;;  %v2134_v4 = vpop.permute.xlu1 %2133  ;;  %v2710_v5 = vrot.slane %v2702_v38, %v4311_v14  ;;  %v2733_v44 = vrot.slane %v2719_v27, %v4311_v14 }
 0x405   : > { %v4497_v51 = vadd.f32 %v2209_v46, %v4238_v10  ;;  %v2210_v37 = vadd.f32 %v2134_v4, %v4218_v55  ;;  %v4501_v47 = vrot.slane %v2494_v3, %v4446_v41  ;;  %v4504_v22 = vrot.slane %v2495_v33, %v4446_v41 }
 0x406   : > { %v2510_v63 = vcombine.low %v2445_v1, %v2461_v62  ;;  %v2511_v40 = vcombine.high %v2445_v1, %v2461_v62  ;;  %v2766_v38 = vcombine.low %v2710_v5, %v2726_v52  ;;  %v4906_v10 = vcombine.high %v4357_v31, %v4347_v43 }
 0x407   : > { %v4508_v39 = vadd.f32 %v2210_v37, %v4244_v12  ;;  %v2527_v55 = vcombine.high %v4463_v45, %v4501_v47  ;;  %v2529_v27 = vcombine.high %v4469_v23, %v4504_v22  ;;  %v2278_v12 = vadd.f32 %v4254_v49, %v2239_v58 }
 0x408   : > { %v4514_v9 = vrot.slane %v4906_v10, %v4446_v41  ;;  %v4521_v62 = vrot.slane %v2510_v63, %v4446_v41  ;;  %v4524_v6 = vrot.slane %v2511_v40, %v4446_v41  ;;  %v4528_v46 = vrot.slane %v2766_v38, %v4446_v41 }
 0x409   : > { %v2767_v43 = vcombine.high %v2710_v5, %v2726_v52  ;;  %v4907_v31 = vcombine.low %v4364_v11, %v4350_v34  ;;  %2944 = vrot.lane.b32.xlu0 %v2527_v55, %s3279_s17  ;;  %v2782_v58 = vcombine.low %v2717_v16, %v2733_v44  ;;  %v2783_v3 = vcombine.high %v2717_v16, %v2733_v44 }
 0x40a   : > { %v2136_v32 = vpop.permute.xlu0 %2135  ;;  %v2531_v1 = vcombine.high %v4478_v29, %v4521_v62  ;;  %v2533_v4 = vcombine.high %v4484_v56, %v4524_v6  ;;  %v2279_v33 = vadd.f32 %v4254_v49, %v2240_v61  ;;  %v2799_v5 = vcombine.high %v4490_v18, %v4528_v46 }
 0x40b   : > { %v4534_v35 = vrot.slane %v4907_v31, %v4446_v41  ;;  %v2211_v52 = vadd.f32 %v2136_v32, %v4224_v59  ;;  %v4908_v37 = vcombine.high %v4364_v11, %v4350_v34  ;;  %v4552_v38 = vrot.slane %v2767_v43, %v4446_v41 }
 0x40c   : > { %v2138_v40 = vpop.permute.xlu1 %2137  ;;  %v4555_v10 = vrot.slane %v2782_v58, %v4446_v41  ;;  %v4558_v61 = vrot.slane %v2783_v3, %v4446_v41  ;;  %v2526_v59 = vcombine.low %v4463_v45, %v4501_v47  ;;  %v2310_v44 = vmax.f32 %v2278_v12, 0.0 }
 0x40d   : > { %v4549_v63 = vrot.slane %v4908_v37, %v4446_v41  ;;  %v2243_v16 = vadd.f32 %v2211_v52, %v4290_v7  ;;  %v2212_v34 = vadd.f32 %v2138_v40, %v4230_v25  ;;  %2952 = vrot.lane.b32.xlu0 %v2529_v27, %s3279_s17  ;;  %v2801_v11 = vcombine.high %v4514_v9, %v4552_v38 }
 0x40e   : > { %v2803_v55 = vcombine.high %v4534_v35, %v4555_v10  ;;  %v2528_v31 = vcombine.low %v4469_v23, %v4504_v22  ;;  %v2311_v32 = vmax.f32 %v2279_v33, 0.0  ;;  %v2346_v33 = vmul.f32 %v4264_v8, %v2310_v44 }
 0x40f   : > { %v2805_v43 = vcombine.high %v4549_v63, %v4558_v61  ;;  %v2282_v12 = vadd.f32 %v4254_v49, %v2243_v16  ;;  %v2244_v7 = vadd.f32 %v2212_v34, %v4299_v15 }
 0x410   : > { %v2347_v16 = vmul.f32 %v4264_v8, %v2311_v32  ;;  %v2382_v3 = vadd.f32 %v4274_v60, %v2346_v33  ;;  %v2280_v32 = vadd.f32 %v4254_v49, %v4497_v51 }
 0x411   : > { %v2314_v37 = vmax.f32 %v2282_v12, 0.0  ;;  %v2283_v15 = vadd.f32 %v4254_v49, %v2244_v7  ;;  %2960 = vrot.lane.b32.xlu0 %v2531_v1, %s3279_s17 }
 0x412   : > { %v2383_v44 = vadd.f32 %v4274_v60, %v2347_v16 }
 0x413   : > { %v2350_v34 = vmul.f32 %v4264_v8, %v2314_v37  ;;  %v2315_v58 = vmax.f32 %v2283_v15, 0.0 }
 0x415   : > { %v2386_v27 = vadd.f32 %v4274_v60, %v2350_v34  ;;  %v2351_v52 = vmul.f32 %v4264_v8, %v2315_v58  ;;  %2968 = vrot.lane.b32.xlu0 %v2533_v4, %s3279_s17  ;;  %v2281_v58 = vadd.f32 %v4254_v49, %v4508_v39 }
 0x417   : > { %v2534_v12 = vcombine.low %v2382_v3, %v2386_v27  ;;  %v2535_v7 = vcombine.high %v2382_v3, %v2386_v27  ;;  %v2387_v40 = vadd.f32 %v4274_v60, %v2351_v52  ;;  %v2312_v3 = vmax.f32 %v2280_v32, 0.0 }
 0x419   : > { %v2806_v1 = vcombine.low %v2383_v44, %v2387_v40  ;;  %v2807_v25 = vcombine.high %v2383_v44, %v2387_v40  ;;  %2976 = vrot.lane.b32.xlu0 %v2799_v5, %s3279_s17  ;;  %v2348_v37 = vmul.f32 %v4264_v8, %v2312_v3 }
 0x41d   : > { %2984 = vrot.lane.b32.xlu0 %v2801_v11, %s3279_s17  ;;  %v2313_v11 = vmax.f32 %v2281_v58, 0.0 }
 0x41f   : > { %v2349_v39 = vmul.f32 %v4264_v8, %v2313_v11 }
 0x421   : > { %2992 = vrot.lane.b32.xlu0 %v2803_v55, %s3279_s17  ;;  %v2385_v58 = vadd.f32 %v4274_v60, %v2349_v39  ;;  %v4650_v39 = vrot.slane %v2806_v1, %v4311_v14 }
 0x425   : > { %3000 = vrot.lane.b32.xlu0 %v2805_v43, %s3279_s17 }
 0x448   : > { %v2140_v4 = vpop.permute.xlu0 %2139 }
 0x449   : > { %v2213_v27 = vadd.f32 %v2140_v4, %v4236_v2 }
 0x44a   : > { %v2142_v52 = vpop.permute.xlu1 %2141 }
 0x44b   : > { %v2245_v33 = vadd.f32 %v2213_v27, %v4320_v36  ;;  %v2214_v5 = vadd.f32 %v2142_v52, %v4242_v42  ;;  %v2384_v42 = vadd.f32 %v4274_v60, %v2348_v37 }
 0x44d   : > { %v2284_v55 = vadd.f32 %v4254_v49, %v2245_v33  ;;  %v2246_v43 = vadd.f32 %v2214_v5, %v4329_v54  ;;  %v4624_v33 = vrot.slane %v2534_v12, %v4311_v14 }
 0x44f   : > { %v2316_v51 = vmax.f32 %v2284_v55, 0.0  ;;  %v2285_v15 = vadd.f32 %v4254_v49, %v2246_v43 }
 0x450   : > { %v2144_v40 = vpop.permute.xlu0 %2143 }
 0x451   : > { %v2352_v2 = vmul.f32 %v4264_v8, %v2316_v51  ;;  %v2317_v16 = vmax.f32 %v2285_v15, 0.0  ;;  %v2215_v36 = vadd.f32 %v2144_v40, %v4286_v20 }
 0x452   : > { %v2146_v34 = vpop.permute.xlu1 %2145 }
 0x453   : > { %v2388_v44 = vadd.f32 %v4274_v60, %v2352_v2  ;;  %v2353_v54 = vmul.f32 %v4264_v8, %v2317_v16  ;;  %v2247_v32 = vadd.f32 %v2215_v36, %v4366_v0  ;;  %v2216_v4 = vadd.f32 %v2146_v34, %v4296_v17 }
 0x454   : > { %v4634_v17 = vrot.slane %v2535_v7, %v4311_v14  ;;  %v4657_v36 = vrot.slane %v2807_v25, %v4311_v14 }
 0x455   : > { %v2550_v27 = vcombine.low %v2384_v42, %v2388_v44  ;;  %v2551_v3 = vcombine.high %v2384_v42, %v2388_v44  ;;  %v2389_v52 = vadd.f32 %v4274_v60, %v2353_v54  ;;  %v2248_v20 = vadd.f32 %v2216_v4, %v4380_v19 }
 0x456   : > { %v2286_v44 = vadd.f32 %v4254_v49, %v2247_v32 }
 0x457   : > { %v4628_v5 = vrot.slane %v2550_v27, %v4311_v14  ;;  %v4631_v11 = vrot.slane %v2551_v3, %v4311_v14  ;;  %v2822_v0 = vcombine.low %v2385_v58, %v2389_v52  ;;  %v2823_v55 = vcombine.high %v2385_v58, %v2389_v52 }
 0x458   : > { %v2148_v43 = vpop.permute.xlu0 %2147  ;;  %v2287_v54 = vadd.f32 %v4254_v49, %v2248_v20 }
 0x459   : > { %v4637_v37 = vrot.slane %v2822_v0, %v4311_v14  ;;  %v2217_v12 = vadd.f32 %v2148_v43, %v4314_v53  ;;  %v2598_v19 = vcombine.low %v4624_v33, %v4628_v5  ;;  %v4643_v51 = vrot.slane %v2823_v55, %v4311_v14 }
 0x45a   : > { %v2150_v15 = vpop.permute.xlu1 %2149  ;;  %v2599_v40 = vcombine.high %v4624_v33, %v4628_v5  ;;  %v2614_v7 = vcombine.low %v4634_v17, %v4631_v11  ;;  %v2615_v16 = vcombine.high %v4634_v17, %v4631_v11  ;;  %v2319_v3 = vmax.f32 %v2287_v54, 0.0 }
 0x45b   : > { %v2249_v2 = vadd.f32 %v2217_v12, %v4396_v26  ;;  %v2218_v53 = vadd.f32 %v2150_v15, %v4325_v13  ;;  %v2870_v34 = vcombine.low %v4650_v39, %v4637_v37  ;;  %v2871_v1 = vcombine.high %v4650_v39, %v4637_v37  ;;  %v4909_v15 = vld [vmem:[#allocation6_spill] sm:$0xff] }
 0x45c   : > { %v2886_v26 = vcombine.low %v4657_v36, %v4643_v51  ;;  %v2887_v13 = vcombine.high %v4657_v36, %v4643_v51  ;;  %v2355_v20 = vmul.f32 %v4264_v8, %v2319_v3 }
 0x45d   : > { %v2250_v42 = vadd.f32 %v2218_v53, %v4407_v28  ;;  %v2318_v28 = vmax.f32 %v2286_v44, 0.0  ;;  %v4728_v11 = vrot.slane %v2871_v1, %v4446_v41 }
 0x45e   : > { %v4734_v17 = vrot.slane %v2886_v26, %v4446_v41  ;;  %v4748_v1 = vrot.slane %v2887_v13, %v4446_v41 }
 0x45f   : > { %v2354_v5 = vmul.f32 %v4264_v8, %v2318_v28  ;;  %v2289_v44 = vadd.f32 %v4254_v49, %v2250_v42  ;;  %v4910_v28 = vld [vmem:[#allocation3_spill] sm:$0xff] }
 0x460   : > { %v2152_v25 = vpop.permute.xlu0 %2151 }
 0x461   : > { %v2219_v4 = vadd.f32 %v2152_v25, %v4360_v21  ;;  %v2288_v21 = vadd.f32 %v4254_v49, %v2249_v2  ;;  %v2390_v53 = vadd.f32 %v4274_v60, %v2354_v5  ;;  %v2391_v2 = vadd.f32 %v4274_v60, %v2355_v20 }
 0x462   : > { %v2154_v58 = vpop.permute.xlu1 %2153  ;;  %v2321_v5 = vmax.f32 %v2289_v44, 0.0  ;;  %v4702_v44 = vrot.slane %v2599_v40, %v4446_v41 }
 0x463   : > { %v2251_v27 = vadd.f32 %v2219_v4, %v4426_v30  ;;  %v2220_v32 = vadd.f32 %v2154_v58, %v4375_v24 }
 0x465   : > { %v2290_v52 = vadd.f32 %v4254_v49, %v2251_v27  ;;  %v2252_v33 = vadd.f32 %v2220_v32, %v4434_v57  ;;  %v2320_v27 = vmax.f32 %v2288_v21, 0.0 }
 0x467   : > { %v2322_v0 = vmax.f32 %v2290_v52, 0.0  ;;  %v2291_v55 = vadd.f32 %v4254_v49, %v2252_v33 }
 0x468   : > { %v2156_v43 = vpop.permute.xlu0 %2155 }
 0x469   : > { %v2358_v12 = vmul.f32 %v4264_v8, %v2322_v0  ;;  %v2323_v30 = vmax.f32 %v2291_v55, 0.0  ;;  %v2221_v24 = vadd.f32 %v2156_v43, %v4909_v15  ;;  %v2356_v43 = vmul.f32 %v4264_v8, %v2320_v27 }
 0x46a   : > { %v2158_v57 = vpop.permute.xlu1 %2157 }
 0x46b   : > { %v2394_v54 = vadd.f32 %v4274_v60, %v2358_v12  ;;  %v2359_v25 = vmul.f32 %v4264_v8, %v2323_v30  ;;  %v2253_v4 = vadd.f32 %v2221_v24, %v4451_v48  ;;  %v2222_v58 = vadd.f32 %v2158_v57, %v4910_v28 }
 0x46c   : > { %v2357_v30 = vmul.f32 %v4264_v8, %v2321_v5  ;;  %v2392_v15 = vadd.f32 %v4274_v60, %v2356_v43  ;;  %v4711_v28 = vrot.slane %v2614_v7, %v4446_v41 }
 0x46d   : > { %v2566_v32 = vcombine.low %v2390_v53, %v2394_v54  ;;  %v2567_v3 = vcombine.high %v2390_v53, %v2394_v54  ;;  %v2395_v52 = vadd.f32 %v4274_v60, %v2359_v25  ;;  %v2292_v33 = vadd.f32 %v4254_v49, %v2253_v4 }
 0x46e   : > { %v2254_v42 = vadd.f32 %v2222_v58, %v4456_v50  ;;  %v4699_v50 = vrot.slane %v2598_v19, %v4446_v41  ;;  %v4717_v19 = vrot.slane %v2870_v34, %v4446_v41 }
 0x46f   : > { %v2838_v0 = vcombine.low %v2391_v2, %v2395_v52  ;;  %v2839_v55 = vcombine.high %v2391_v2, %v2395_v52  ;;  %v2324_v12 = vmax.f32 %v2292_v33, 0.0  ;;  %v2574_v4 = vrot.slane %v2566_v32, %v4311_v14 }
 0x470   : > { %v2293_v48 = vadd.f32 %v4254_v49, %v2254_v42  ;;  %v2393_v49 = vadd.f32 %v4274_v60, %v2357_v30  ;;  %v2581_v27 = vrot.slane %v2567_v3, %v4311_v14 }
 0x471   : > { %v2360_v20 = vmul.f32 %v4264_v8, %v2324_v12  ;;  %v2846_v32 = vrot.slane %v2838_v0, %v4311_v14  ;;  %v2853_v52 = vrot.slane %v2839_v55, %v4311_v14 }
 0x472   : > { %v2325_v21 = vmax.f32 %v2293_v48, 0.0 }
 0x473   : > { %v2396_v24 = vadd.f32 %v4274_v60, %v2360_v20 }
 0x474   : > { %v2361_v53 = vmul.f32 %v4264_v8, %v2325_v21  ;;  %v4714_v8 = vrot.slane %v2615_v16, %v4446_v41 }
 0x475   : > { %v2582_v57 = vcombine.low %v2392_v15, %v2396_v24  ;;  %v2583_v54 = vcombine.high %v2392_v15, %v2396_v24 }
 0x476   : > { %v2397_v25 = vadd.f32 %v4274_v60, %v2361_v53 }
 0x477   : > { %v2590_v40 = vrot.slane %v2582_v57, %v4311_v14  ;;  %v2597_v58 = vrot.slane %v2583_v54, %v4311_v14 }
 0x478   : > { %v2854_v2 = vcombine.low %v2393_v49, %v2397_v25  ;;  %v2855_v60 = vcombine.high %v2393_v49, %v2397_v25 }
 0x479   : > { %v2630_v34 = vcombine.low %v2574_v4, %v2590_v40  ;;  %v2631_v3 = vcombine.high %v2574_v4, %v2590_v40  ;;  %v2646_v37 = vcombine.low %v2581_v27, %v2597_v58  ;;  %v2647_v39 = vcombine.high %v2581_v27, %v2597_v58 }
 0x47a   : > { %v2862_v7 = vrot.slane %v2854_v2, %v4311_v14  ;;  %v2869_v16 = vrot.slane %v2855_v60, %v4311_v14  ;;  %v4912_v40 = vcombine.low %v4484_v56, %v4524_v6  ;;  %v4914_v56 = vcombine.low %v4514_v9, %v4552_v38 }
 0x47b   : > { %v2945_v26 = vpop.permute.xlu0 %2944  ;;  %v2638_v33 = vrot.slane %v2630_v34, %v4446_v41  ;;  %v4752_v5 = vrot.slane %v2631_v3, %v4446_v41  ;;  %v4759_v55 = vrot.slane %v2646_v37, %v4446_v41  ;;  %v4762_v51 = vrot.slane %v2647_v39, %v4446_v41 }
 0x47c   : > { %v2902_v14 = vcombine.low %v2846_v32, %v2862_v7  ;;  %v2903_v42 = vcombine.high %v2846_v32, %v2862_v7  ;;  %v3006_v0 = vsel %vm199_vm0, %v2526_v59, %v2945_v26  ;;  %v2918_v36 = vcombine.low %v2853_v52, %v2869_v16 }
 0x47d   : > { %3022 = vst [vmem:[%s4742_s11] sm:$0xff] %v3006_v0  ;;  %v2663_v13 = vcombine.high %v4699_v50, %v2638_v33  ;;  %v2665_v43 = vcombine.high %v4702_v44, %v4752_v5  ;;  %v2667_v47 = vcombine.high %v4711_v28, %v4759_v55  ;;  %v2669_v59 = vcombine.high %v4714_v8, %v4762_v51 }
 0x47e   : > { %v4769_v12 = vrot.slane %v2902_v14, %v4446_v41  ;;  %v4772_v45 = vrot.slane %v2903_v42, %v4446_v41  ;;  %v4779_v48 = vrot.slane %v2918_v36, %v4446_v41  ;;  %v2919_v30 = vcombine.high %v2853_v52, %v2869_v16 }
 0x47f   : > { %2946 = vrot.lane.b32.xlu1 %v2663_v13, %s3279_s17  ;;  %v2953_v20 = vpop.permute.xlu0 %2952  ;;  %v2662_v24 = vcombine.low %v4699_v50, %v2638_v33  ;;  %v2664_v53 = vcombine.low %v4702_v44, %v4752_v5  ;;  %v2666_v25 = vcombine.low %v4711_v28, %v4759_v55  ;;  %v2668_v50 = vcombine.low %v4714_v8, %v4762_v51 }
 0x480   : > { %v2935_v21 = vcombine.high %v4717_v19, %v4769_v12  ;;  %v2937_v15 = vcombine.high %v4728_v11, %v4772_v45  ;;  %v3008_v49 = vsel %vm199_vm0, %v2528_v31, %v2953_v20  ;;  %v2939_v57 = vcombine.high %v4734_v17, %v4779_v48 }
 0x481   : > { %v2933_v54 = vrot.slane %v2919_v30, %v4446_v41  ;;  %3023 = vst [vmem:[%s4742_s11 + $0x8] sm:$0xff] %v3008_v49  ;;  %v2934_v44 = vcombine.low %v4717_v19, %v4769_v12  ;;  %v2936_v23 = vcombine.low %v4728_v11, %v4772_v45  ;;  %v2938_v22 = vcombine.low %v4734_v17, %v4779_v48 }
 0x482   : > { %v4911_v28 = vcombine.low %v4478_v29, %v4521_v62  ;;  %v4913_v29 = vcombine.low %v4490_v18, %v4528_v46  ;;  %v4915_v18 = vcombine.low %v4534_v35, %v4555_v10  ;;  %v4916_v9 = vcombine.low %v4549_v63, %v4558_v61 }
 0x483   : > { %v2941_v41 = vcombine.high %v4748_v1, %v2933_v54  ;;  %v2940_v31 = vcombine.low %v4748_v1, %v2933_v54  ;;  %2954 = vrot.lane.b32.xlu1 %v2665_v43, %s3279_s17  ;;  %v2961_v4 = vpop.permute.xlu0 %2960 }
 0x484   : > { %v3010_v8 = vsel %vm199_vm0, %v4911_v28, %v2961_v4 }
 0x485   : > { %3024 = vst [vmem:[%s4742_s11 + $0x10] sm:$0xff] %v3010_v8 }
 0x487   : > { %2962 = vrot.lane.b32.xlu1 %v2667_v47, %s3279_s17  ;;  %v2969_v19 = vpop.permute.xlu0 %2968 }
 0x488   : > { %v3012_v58 = vsel %vm199_vm0, %v4912_v40, %v2969_v19 }
 0x489   : > { %3025 = vst [vmem:[%s4742_s11 + $0x18] sm:$0xff] %v3012_v58 }
 0x48b   : > { %2970 = vrot.lane.b32.xlu1 %v2669_v59, %s3279_s17  ;;  %v2977_v2 = vpop.permute.xlu0 %2976 }
 0x48c   : > { %v3014_v62 = vsel %vm199_vm0, %v4913_v29, %v2977_v2 }
 0x48d   : > { %3026 = vst [vmem:[%s4742_s11 + $0x20] sm:$0xff] %v3014_v62 }
 0x48f   : > { %2978 = vrot.lane.b32.xlu1 %v2935_v21, %s3279_s17  ;;  %v2985_v60 = vpop.permute.xlu0 %2984 }
 0x490   : > { %v3016_v6 = vsel %vm199_vm0, %v4914_v56, %v2985_v60 }
 0x491   : > { %3027 = vst [vmem:[%s4742_s11 + $0x28] sm:$0xff] %v3016_v6 }
 0x493   : > { %2986 = vrot.lane.b32.xlu1 %v2937_v15, %s3279_s17  ;;  %v2993_v27 = vpop.permute.xlu0 %2992 }
 0x494   : > { %v3018_v46 = vsel %vm199_vm0, %v4915_v18, %v2993_v27 }
 0x495   : > { %3028 = vst [vmem:[%s4742_s11 + $0x30] sm:$0xff] %v3018_v46 }
 0x497   : > { %2994 = vrot.lane.b32.xlu1 %v2939_v57, %s3279_s17  ;;  %v3001_v32 = vpop.permute.xlu0 %3000 }
 0x498   : > { %v3020_v38 = vsel %vm199_vm0, %v4916_v9, %v3001_v32 }
 0x499   : > { %3029 = vst [vmem:[%s4742_s11 + $0x38] sm:$0xff] %v3020_v38 }
 0x49b   : > { %3002 = vrot.lane.b32.xlu1 %v2941_v41, %s3279_s17 }
 0x4f1   : > { %v2947_v11 = vpop.permute.xlu1 %2946 }
 0x4f2   : > { %v3007_v35 = vsel %vm199_vm0, %v2662_v24, %v2947_v11 }
 0x4f3   : > { %3030 = vst [vmem:[%s4742_s11 + $0x40] sm:$0xff] %v3007_v35 }
 0x4f5   : > { %v2955_v10 = vpop.permute.xlu1 %2954 }
 0x4f6   : > { %v3009_v17 = vsel %vm199_vm0, %v2664_v53, %v2955_v10 }
 0x4f7   : > { %3031 = vst [vmem:[%s4742_s11 + $0x48] sm:$0xff] %v3009_v17 }
 0x4f9   : > { %v2963_v7 = vpop.permute.xlu1 %2962 }
 0x4fa   : > { %v3011_v16 = vsel %vm199_vm0, %v2666_v25, %v2963_v7 }
 0x4fb   : > { %3032 = vst [vmem:[%s4742_s11 + $0x50] sm:$0xff] %v3011_v16 }
 0x4fd   : > { %v2971_v63 = vpop.permute.xlu1 %2970 }
 0x4fe   : > { %v3013_v61 = vsel %vm199_vm0, %v2668_v50, %v2971_v63 }
 0x4ff   : > { %3033 = vst [vmem:[%s4742_s11 + $0x58] sm:$0xff] %v3013_v61 }
 0x501   : > { %v2979_v34 = vpop.permute.xlu1 %2978 }
 0x502   : > { %v3015_v3 = vsel %vm199_vm0, %v2934_v44, %v2979_v34 }
 0x503   : > { %3034 = vst [vmem:[%s4742_s11 + $0x60] sm:$0xff] %v3015_v3 }
 0x505   : > { %v2987_v52 = vpop.permute.xlu1 %2986 }
 0x506   : > { %v3017_v37 = vsel %vm199_vm0, %v2936_v23, %v2987_v52 }
 0x507   : > { %3035 = vst [vmem:[%s4742_s11 + $0x68] sm:$0xff] %v3017_v37 }
 0x509   : > { %v2995_v39 = vpop.permute.xlu1 %2994 }
 0x50a   : > { %v3019_v1 = vsel %vm199_vm0, %v2938_v22, %v2995_v39 }
 0x50b   : > { %3036 = vst [vmem:[%s4742_s11 + $0x70] sm:$0xff] %v3019_v1 }
 0x50d   : > { %v3003_v26 = vpop.permute.xlu1 %3002 }
 0x50e   : > { %v3021_v33 = vsel %vm199_vm0, %v2940_v31, %v3003_v26 }
 0x50f   : > { %3037 = vst [vmem:[%s4742_s11 + $0x78] sm:$0xff] %v3021_v33 }
 0x510 PF: > { %s14_s15 = sadd.s32 1, %s3276_s15  }
 0x511   : > { %p11_p4 = scmp.ge.s32.totalorder %s14_s15, 4  }
 0x513   :  { %13 = sbr.rel (!%p11_p4) target bundleno = 1 (0x1), region = 68 }

</bundles_post_ra>
